<compile_context>
chip_gen: v7x
topology: tpu7x:2x2x1
jax: 0.10.0
libtpu: 0.0.40
codegen_flags: <defaults>
</compile_context>

<pallas_src>
import jax
import jax.numpy as jnp
from jax import lax
from jax.experimental import pallas as pl
from jax.experimental.pallas import tpu as pltpu

_INV_SQRT2 = 0.7071067811865476


def _gelu_exact(x):
    # exact GELU (PyTorch nn.GELU default, approximate='none')
    return 0.5 * x * (1.0 + lax.erf(x * _INV_SQRT2))


def _layernorm(x, gamma, beta, eps=1e-5):
    mu = jnp.mean(x, axis=-1, keepdims=True)
    var = jnp.mean((x - mu) ** 2, axis=-1, keepdims=True)
    return (x - mu) * lax.rsqrt(var + eps) * gamma + beta


def mixer_block_kernel(x_ref, mask_ref,
                       g1_ref, be1_ref, wt1_ref, bt1_ref, wt2_ref, bt2_ref,
                       g2_ref, be2_ref, wc1_ref, bc1_ref, wc2_ref, bc2_ref,
                       out_ref):
    BB, N, D = x_ref.shape
    bf16 = jnp.bfloat16

    # mask-mul (mask broadcast across the D lane dim)
    x = x_ref[...].astype(jnp.float32) * mask_ref[...]            # (BB, N, D)

    # ---------------- token mixing branch ----------------
    x2 = x.reshape(BB * N, D)
    y = _layernorm(x2, g1_ref[...], be1_ref[...])                 # (BB*N, D) f32
    y3 = y.reshape(BB, N, D).astype(bf16)

    wt1 = wt1_ref[...]                                            # (N, TH) bf16
    wt2 = wt2_ref[...]                                            # (TH, N) bf16
    bt1 = bt1_ref[...]                                            # (TH, 1) f32
    bt2 = bt2_ref[...]                                            # (N, 1)  f32

    t_blocks = []
    # Short unrolled loop over the (small, static) batch block; D stays the
    # lane dim through both matmuls, so no relayouts are needed.
    for b in range(BB):
        # h[th, d] = sum_n wt1[n, th] * y[b, n, d]
        h = lax.dot_general(wt1, y3[b], (((0,), (0,)), ((), ())),
                            preferred_element_type=jnp.float32)   # (TH, D)
        h = _gelu_exact(h + bt1)
        # t[n, d] = sum_th wt2[th, n] * h[th, d]
        t = lax.dot_general(wt2, h.astype(bf16), (((0,), (0,)), ((), ())),
                            preferred_element_type=jnp.float32)   # (N, D)
        t_blocks.append(t + bt2)
    x = x + jnp.stack(t_blocks, axis=0)                           # (BB, N, D)

    # ---------------- embedding (channel) mixing branch ----------------
    x2 = x.reshape(BB * N, D)
    y = _layernorm(x2, g2_ref[...], be2_ref[...])                 # (BB*N, D)
    h = jnp.dot(y.astype(bf16), wc1_ref[...],
                preferred_element_type=jnp.float32) + bc1_ref[...]  # (BB*N, EH)
    h = _gelu_exact(h)
    c = jnp.dot(h.astype(bf16), wc2_ref[...],
                preferred_element_type=jnp.float32) + bc2_ref[...]  # (BB*N, D)

    out_ref[...] = (x2 + c).reshape(BB, N, D).astype(out_ref.dtype)


def mixer_block(x, attention_mask, p, *, block_b=None):
    """x: (B, N, D) float32, attention_mask: (B, N)."""
    B, N, D = x.shape
    TH = p["wt1"].shape[1]
    EH = p["wc1"].shape[1]

    if block_b is None:
        # largest divisor of B whose f32 (block_b, N, D) block stays <= ~4 MiB
        budget = 4 * 1024 * 1024
        block_b = 1
        for cand in range(1, B + 1):
            if B % cand == 0 and cand * N * D * 4 <= budget:
                block_b = cand
    assert B % block_b == 0

    mask3 = attention_mask.astype(jnp.float32)[:, :, None]        # (B, N, 1)

    # Carry matmul weights in bf16 (halves weight DMA bytes; MXU operands are
    # bf16 with f32 accumulation).  Biases / LN params stay f32.
    bf16 = jnp.bfloat16
    wt1 = p["wt1"].astype(bf16)
    wt2 = p["wt2"].astype(bf16)
    wc1 = p["wc1"].astype(bf16)
    wc2 = p["wc2"].astype(bf16)

    def rep(shape):
        # grid-invariant (replicated) operand: fetched once, reused every step
        return pl.BlockSpec(shape, lambda i: (0,) * len(shape))

    grid_spec = pltpu.PrefetchScalarGridSpec(
        num_scalar_prefetch=0,
        grid=(B // block_b,),
        in_specs=[
            pl.BlockSpec((block_b, N, D), lambda i: (i, 0, 0)),   # x
            pl.BlockSpec((block_b, N, 1), lambda i: (i, 0, 0)),   # mask
            rep((1, D)), rep((1, D)),                             # LN1 gamma/beta
            rep((N, TH)), rep((TH, 1)),                           # token-mix W1^T, b1
            rep((TH, N)), rep((N, 1)),                            # token-mix W2^T, b2
            rep((1, D)), rep((1, D)),                             # LN2 gamma/beta
            rep((D, EH)), rep((1, EH)),                           # channel-mix W1^T, b1
            rep((EH, D)), rep((1, D)),                            # channel-mix W2^T, b2
        ],
        out_specs=pl.BlockSpec((block_b, N, D), lambda i: (i, 0, 0)),
    )
    return pl.pallas_call(
        mixer_block_kernel,
        out_shape=jax.ShapeDtypeStruct((B, N, D), x.dtype),
        grid_spec=grid_spec,
        compiler_params=pltpu.CompilerParams(
            dimension_semantics=("parallel",),        # batch blocks independent
            vmem_limit_bytes=64 * 1024 * 1024,
        ),
    )(x, mask3,
      p["g1"], p["be1"], wt1, p["bt1"], wt2, p["bt2"],
      p["g2"], p["be2"], wc1, p["bc1"], wc2, p["bc2"])


def mixer_block_ref(x, attention_mask, p):
    """Pure-JAX f32 reference mirroring the PyTorch forward (dropout p=0)."""
    att = attention_mask.astype(x.dtype)[:, :, None]
    x = x * att

    def ln(v, g, b):
        mu = v.mean(-1, keepdims=True)
        var = ((v - mu) ** 2).mean(-1, keepdims=True)
        return (v - mu) / jnp.sqrt(var + 1e-5) * g + b

    gelu = lambda v: 0.5 * v * (1.0 + lax.erf(v * _INV_SQRT2))
    hp = dict(precision="highest")

    # token mixing: LN -> (b d n) -> Linear(N->TH) -> GELU -> Linear(TH->N) -> (b n d)
    y = ln(x, p["g1"][0], p["be1"][0])
    yt = jnp.swapaxes(y, 1, 2)                                    # (B, D, N)
    h = gelu(jnp.einsum("bdn,nh->bdh", yt, p["wt1"], **hp) + p["bt1"][:, 0])
    t = jnp.einsum("bdh,hn->bdn", h, p["wt2"], **hp) + p["bt2"][:, 0]
    x = x + jnp.swapaxes(t, 1, 2)

    # embedding mixing: LN -> Linear(D->EH) -> GELU -> Linear(EH->D)
    y = ln(x, p["g2"][0], p["be2"][0])
    h = gelu(jnp.einsum("bnd,de->bne", y, p["wc1"], **hp) + p["bc1"][0])
    x = x + jnp.einsum("bne,ed->bnd", h, p["wc2"], **hp) + p["bc2"][0]
    return x


def init_params(key, embed_dim, num_tokens, token_hid, embed_hid):
    ks = jax.random.split(key, 10)
    f32 = jnp.float32
    return {
        # LayerNorm 1 / 2 (small perturbations so the affine paths are exercised)
        "g1": 1.0 + 0.1 * jax.random.normal(ks[4], (1, embed_dim), f32),
        "be1": 0.1 * jax.random.normal(ks[5], (1, embed_dim), f32),
        "g2": 1.0 + 0.1 * jax.random.normal(ks[6], (1, embed_dim), f32),
        "be2": 0.1 * jax.random.normal(ks[7], (1, embed_dim), f32),
        # token-mix FeedForward(num_tokens -> token_hid -> num_tokens)
        # weights stored transposed to (in, out); biases shaped for the
        # kernel's (TH, D)/(N, D) lane-dense intermediates
        "wt1": 0.02 * jax.random.normal(ks[0], (num_tokens, token_hid), f32),
        "bt1": 0.02 * jax.random.normal(ks[8], (token_hid, 1), f32),
        "wt2": 0.02 * jax.random.normal(ks[1], (token_hid, num_tokens), f32),
        "bt2": 0.02 * jax.random.normal(ks[9], (num_tokens, 1), f32),
        # embedding-mix FeedForward(embed_dim -> embed_hid -> embed_dim)
        "wc1": 0.02 * jax.random.normal(ks[2], (embed_dim, embed_hid), f32),
        "bc1": jnp.zeros((1, embed_hid), f32),
        "wc2": 0.02 * jax.random.normal(ks[3], (embed_hid, embed_dim), f32),
        "bc2": jnp.zeros((1, embed_dim), f32),
    }


if __name__ == "__main__":
    # Small but lane-friendly shapes: D, EH multiples of 128; N, TH multiples of 8.
    B, N, D = 8, 16, 128        # batch, num_tokens, embed_dim
    TH, EH = 64, 256            # token_hid_dim, embedding_hid_dim
    # TODO(synk): dropout not modeled (p=0.0 -> identity at inference)

    key = jax.random.PRNGKey(0)
    kx, km, kp = jax.random.split(key, 3)
    x = jax.random.normal(kx, (B, N, D), jnp.float32)
    attention_mask = (jax.random.uniform(km, (B, N)) > 0.3).astype(jnp.float32)
    params = init_params(kp, D, N, TH, EH)

    out = jax.block_until_ready(mixer_block(x, attention_mask, params, block_b=4))
    ref = jax.block_until_ready(mixer_block_ref(x, attention_mask, params))

    assert out.shape == (B, N, D)
    max_err = float(jnp.max(jnp.abs(out - ref)))
    # bf16 MXU operands vs f32 'highest' reference -> ~1e-4..1e-3 abs error
    assert jnp.allclose(out, ref, atol=2e-3, rtol=2e-3), f"max abs err {max_err}"
    print("KERNEL_OK")
</pallas_src>

<mosaic_0001>
module attributes {stable_mosaic.version = 11 : i64} {
  func.func @mixer_block_kernel(%arg0: i32, %arg1: memref<4x16x128xf32, #tpu.memory_space<vmem>>, %arg2: memref<4x16x1xf32, #tpu.memory_space<vmem>>, %arg3: memref<1x128xf32, #tpu.memory_space<vmem>>, %arg4: memref<1x128xf32, #tpu.memory_space<vmem>>, %arg5: memref<16x64xbf16, #tpu.memory_space<vmem>>, %arg6: memref<64x1xf32, #tpu.memory_space<vmem>>, %arg7: memref<64x16xbf16, #tpu.memory_space<vmem>>, %arg8: memref<16x1xf32, #tpu.memory_space<vmem>>, %arg9: memref<1x128xf32, #tpu.memory_space<vmem>>, %arg10: memref<1x128xf32, #tpu.memory_space<vmem>>, %arg11: memref<128x256xbf16, #tpu.memory_space<vmem>>, %arg12: memref<1x256xf32, #tpu.memory_space<vmem>>, %arg13: memref<256x128xbf16, #tpu.memory_space<vmem>>, %arg14: memref<1x128xf32, #tpu.memory_space<vmem>>, %arg15: memref<4x16x128xf32, #tpu.memory_space<vmem>>) attributes {dimension_semantics = [#tpu.dimension_semantics<parallel>], iteration_bounds = array<i64: 2>, scalar_prefetch = 0 : i64, scratch_operands = 0 : i64, tpu.core_type = #tpu.core_type<tc>, window_params = [{transform_indices = @transform_0, window_bounds = array<i64: 4, 16, 128>}, {transform_indices = @transform_1, window_bounds = array<i64: 4, 16, 1>}, {pipeline_mode = #tpu.pipeline_mode<synchronous>, transform_indices = @transform_2, window_bounds = array<i64: 1, 128>}, {pipeline_mode = #tpu.pipeline_mode<synchronous>, transform_indices = @transform_3, window_bounds = array<i64: 1, 128>}, {pipeline_mode = #tpu.pipeline_mode<synchronous>, transform_indices = @transform_4, window_bounds = array<i64: 16, 64>}, {pipeline_mode = #tpu.pipeline_mode<synchronous>, transform_indices = @transform_5, window_bounds = array<i64: 64, 1>}, {pipeline_mode = #tpu.pipeline_mode<synchronous>, transform_indices = @transform_6, window_bounds = array<i64: 64, 16>}, {pipeline_mode = #tpu.pipeline_mode<synchronous>, transform_indices = @transform_7, window_bounds = array<i64: 16, 1>}, {pipeline_mode = #tpu.pipeline_mode<synchronous>, transform_indices = @transform_8, window_bounds = array<i64: 1, 128>}, {pipeline_mode = #tpu.pipeline_mode<synchronous>, transform_indices = @transform_9, window_bounds = array<i64: 1, 128>}, {pipeline_mode = #tpu.pipeline_mode<synchronous>, transform_indices = @transform_10, window_bounds = array<i64: 128, 256>}, {pipeline_mode = #tpu.pipeline_mode<synchronous>, transform_indices = @transform_11, window_bounds = array<i64: 1, 256>}, {pipeline_mode = #tpu.pipeline_mode<synchronous>, transform_indices = @transform_12, window_bounds = array<i64: 256, 128>}, {pipeline_mode = #tpu.pipeline_mode<synchronous>, transform_indices = @transform_13, window_bounds = array<i64: 1, 128>}, {transform_indices = @transform_14, window_bounds = array<i64: 4, 16, 128>}]} {
    %c0 = arith.constant 0 : index
    %c0_0 = arith.constant 0 : index
    %c0_1 = arith.constant 0 : index
    %0 = vector.load %arg1[%c0, %c0_0, %c0_1] : memref<4x16x128xf32, #tpu.memory_space<vmem>>, vector<4x16x128xf32>
    %c0_2 = arith.constant 0 : index
    %c0_3 = arith.constant 0 : index
    %c0_4 = arith.constant 0 : index
    %1 = vector.load %arg2[%c0_2, %c0_3, %c0_4] : memref<4x16x1xf32, #tpu.memory_space<vmem>>, vector<4x16x1xf32>
    %2 = vector.broadcast %1 : vector<4x16x1xf32> to vector<4x16x128xf32>
    %3 = arith.mulf %0, %2 : vector<4x16x128xf32>
    %4 = vector.shape_cast %3 : vector<4x16x128xf32> to vector<64x128xf32>
    %c0_5 = arith.constant 0 : index
    %c0_6 = arith.constant 0 : index
    %5 = vector.load %arg3[%c0_5, %c0_6] : memref<1x128xf32, #tpu.memory_space<vmem>>, vector<1x128xf32>
    %c0_7 = arith.constant 0 : index
    %c0_8 = arith.constant 0 : index
    %6 = vector.load %arg4[%c0_7, %c0_8] : memref<1x128xf32, #tpu.memory_space<vmem>>, vector<1x128xf32>
    %cst = arith.constant dense<0.000000e+00> : vector<64xf32>
    %7 = vector.multi_reduction <add>, %4, %cst [1] : vector<64x128xf32> to vector<64xf32>
    %8 = vector.shape_cast %7 : vector<64xf32> to vector<64x1xf32>
    %cst_9 = arith.constant 1.280000e+02 : f32
    %9 = vector.broadcast %cst_9 : f32 to vector<64x1xf32>
    %10 = arith.divf %8, %9 : vector<64x1xf32>
    %11 = vector.broadcast %10 : vector<64x1xf32> to vector<64x128xf32>
    %12 = arith.subf %4, %11 : vector<64x128xf32>
    %13 = arith.mulf %12, %12 : vector<64x128xf32>
    %cst_10 = arith.constant dense<0.000000e+00> : vector<64xf32>
    %14 = vector.multi_reduction <add>, %13, %cst_10 [1] : vector<64x128xf32> to vector<64xf32>
    %15 = vector.shape_cast %14 : vector<64xf32> to vector<64x1xf32>
    %cst_11 = arith.constant 1.280000e+02 : f32
    %16 = vector.broadcast %cst_11 : f32 to vector<64x1xf32>
    %17 = arith.divf %15, %16 : vector<64x1xf32>
    %18 = vector.broadcast %10 : vector<64x1xf32> to vector<64x128xf32>
    %19 = arith.subf %4, %18 : vector<64x128xf32>
    %cst_12 = arith.constant 9.99999974E-6 : f32
    %20 = vector.broadcast %cst_12 : f32 to vector<64x1xf32>
    %21 = arith.addf %17, %20 : vector<64x1xf32>
    %22 = math.rsqrt %21 : vector<64x1xf32>
    %23 = vector.broadcast %22 : vector<64x1xf32> to vector<64x128xf32>
    %24 = arith.mulf %19, %23 : vector<64x128xf32>
    %25 = vector.broadcast %5 : vector<1x128xf32> to vector<64x128xf32>
    %26 = arith.mulf %24, %25 : vector<64x128xf32>
    %27 = vector.broadcast %6 : vector<1x128xf32> to vector<64x128xf32>
    %28 = arith.addf %26, %27 : vector<64x128xf32>
    %29 = vector.shape_cast %28 : vector<64x128xf32> to vector<4x16x128xf32>
    %30 = arith.truncf %29 : vector<4x16x128xf32> to vector<4x16x128xbf16>
    %c0_13 = arith.constant 0 : index
    %c0_14 = arith.constant 0 : index
    %31 = vector.load %arg5[%c0_13, %c0_14] : memref<16x64xbf16, #tpu.memory_space<vmem>>, vector<16x64xbf16>
    %c0_15 = arith.constant 0 : index
    %c0_16 = arith.constant 0 : index
    %32 = vector.load %arg7[%c0_15, %c0_16] : memref<64x16xbf16, #tpu.memory_space<vmem>>, vector<64x16xbf16>
    %c0_17 = arith.constant 0 : index
    %c0_18 = arith.constant 0 : index
    %33 = vector.load %arg6[%c0_17, %c0_18] : memref<64x1xf32, #tpu.memory_space<vmem>>, vector<64x1xf32>
    %c0_19 = arith.constant 0 : index
    %c0_20 = arith.constant 0 : index
    %34 = vector.load %arg8[%c0_19, %c0_20] : memref<16x1xf32, #tpu.memory_space<vmem>>, vector<16x1xf32>
    %35 = vector.extract_strided_slice %30 {offsets = [0, 0, 0], sizes = [1, 16, 128], strides = [1, 1, 1]} : vector<4x16x128xbf16> to vector<1x16x128xbf16>
    %36 = vector.shape_cast %35 : vector<1x16x128xbf16> to vector<16x128xbf16>
    %cst_21 = arith.constant dense<0.000000e+00> : vector<64x128xf32>
    %37 = tpu.matmul %31, %36, %cst_21 {dimension_numbers = #tpu.dot_dimension_numbers<[0], [0], [1], [1], [0, 1, 1, 1], [], []>} : vector<16x64xbf16>, vector<16x128xbf16>, vector<64x128xf32> -> vector<64x128xf32>
    %38 = vector.broadcast %33 : vector<64x1xf32> to vector<64x128xf32>
    %39 = arith.addf %37, %38 : vector<64x128xf32>
    %cst_22 = arith.constant 5.000000e-01 : f32
    %40 = vector.broadcast %cst_22 : f32 to vector<64x128xf32>
    %41 = arith.mulf %40, %39 : vector<64x128xf32>
    %cst_23 = arith.constant 0.707106769 : f32
    %42 = vector.broadcast %cst_23 : f32 to vector<64x128xf32>
    %43 = arith.mulf %39, %42 : vector<64x128xf32>
    %44 = math.erf %43 : vector<64x128xf32>
    %cst_24 = arith.constant 1.000000e+00 : f32
    %45 = vector.broadcast %cst_24 : f32 to vector<64x128xf32>
    %46 = arith.addf %45, %44 : vector<64x128xf32>
    %47 = arith.mulf %41, %46 : vector<64x128xf32>
    %48 = arith.truncf %47 : vector<64x128xf32> to vector<64x128xbf16>
    %cst_25 = arith.constant dense<0.000000e+00> : vector<16x128xf32>
    %49 = tpu.matmul %32, %48, %cst_25 {dimension_numbers = #tpu.dot_dimension_numbers<[0], [0], [1], [1], [0, 1, 1, 1], [], []>} : vector<64x16xbf16>, vector<64x128xbf16>, vector<16x128xf32> -> vector<16x128xf32>
    %50 = vector.broadcast %34 : vector<16x1xf32> to vector<16x128xf32>
    %51 = arith.addf %49, %50 : vector<16x128xf32>
    %52 = vector.extract_strided_slice %30 {offsets = [1, 0, 0], sizes = [1, 16, 128], strides = [1, 1, 1]} : vector<4x16x128xbf16> to vector<1x16x128xbf16>
    %53 = vector.shape_cast %52 : vector<1x16x128xbf16> to vector<16x128xbf16>
    %cst_26 = arith.constant dense<0.000000e+00> : vector<64x128xf32>
    %54 = tpu.matmul %31, %53, %cst_26 {dimension_numbers = #tpu.dot_dimension_numbers<[0], [0], [1], [1], [0, 1, 1, 1], [], []>} : vector<16x64xbf16>, vector<16x128xbf16>, vector<64x128xf32> -> vector<64x128xf32>
    %55 = vector.broadcast %33 : vector<64x1xf32> to vector<64x128xf32>
    %56 = arith.addf %54, %55 : vector<64x128xf32>
    %cst_27 = arith.constant 5.000000e-01 : f32
    %57 = vector.broadcast %cst_27 : f32 to vector<64x128xf32>
    %58 = arith.mulf %57, %56 : vector<64x128xf32>
    %cst_28 = arith.constant 0.707106769 : f32
    %59 = vector.broadcast %cst_28 : f32 to vector<64x128xf32>
    %60 = arith.mulf %56, %59 : vector<64x128xf32>
    %61 = math.erf %60 : vector<64x128xf32>
    %cst_29 = arith.constant 1.000000e+00 : f32
    %62 = vector.broadcast %cst_29 : f32 to vector<64x128xf32>
    %63 = arith.addf %62, %61 : vector<64x128xf32>
    %64 = arith.mulf %58, %63 : vector<64x128xf32>
    %65 = arith.truncf %64 : vector<64x128xf32> to vector<64x128xbf16>
    %cst_30 = arith.constant dense<0.000000e+00> : vector<16x128xf32>
    %66 = tpu.matmul %32, %65, %cst_30 {dimension_numbers = #tpu.dot_dimension_numbers<[0], [0], [1], [1], [0, 1, 1, 1], [], []>} : vector<64x16xbf16>, vector<64x128xbf16>, vector<16x128xf32> -> vector<16x128xf32>
    %67 = vector.broadcast %34 : vector<16x1xf32> to vector<16x128xf32>
    %68 = arith.addf %66, %67 : vector<16x128xf32>
    %69 = vector.extract_strided_slice %30 {offsets = [2, 0, 0], sizes = [1, 16, 128], strides = [1, 1, 1]} : vector<4x16x128xbf16> to vector<1x16x128xbf16>
    %70 = vector.shape_cast %69 : vector<1x16x128xbf16> to vector<16x128xbf16>
    %cst_31 = arith.constant dense<0.000000e+00> : vector<64x128xf32>
    %71 = tpu.matmul %31, %70, %cst_31 {dimension_numbers = #tpu.dot_dimension_numbers<[0], [0], [1], [1], [0, 1, 1, 1], [], []>} : vector<16x64xbf16>, vector<16x128xbf16>, vector<64x128xf32> -> vector<64x128xf32>
    %72 = vector.broadcast %33 : vector<64x1xf32> to vector<64x128xf32>
    %73 = arith.addf %71, %72 : vector<64x128xf32>
    %cst_32 = arith.constant 5.000000e-01 : f32
    %74 = vector.broadcast %cst_32 : f32 to vector<64x128xf32>
    %75 = arith.mulf %74, %73 : vector<64x128xf32>
    %cst_33 = arith.constant 0.707106769 : f32
    %76 = vector.broadcast %cst_33 : f32 to vector<64x128xf32>
    %77 = arith.mulf %73, %76 : vector<64x128xf32>
    %78 = math.erf %77 : vector<64x128xf32>
    %cst_34 = arith.constant 1.000000e+00 : f32
    %79 = vector.broadcast %cst_34 : f32 to vector<64x128xf32>
    %80 = arith.addf %79, %78 : vector<64x128xf32>
    %81 = arith.mulf %75, %80 : vector<64x128xf32>
    %82 = arith.truncf %81 : vector<64x128xf32> to vector<64x128xbf16>
    %cst_35 = arith.constant dense<0.000000e+00> : vector<16x128xf32>
    %83 = tpu.matmul %32, %82, %cst_35 {dimension_numbers = #tpu.dot_dimension_numbers<[0], [0], [1], [1], [0, 1, 1, 1], [], []>} : vector<64x16xbf16>, vector<64x128xbf16>, vector<16x128xf32> -> vector<16x128xf32>
    %84 = vector.broadcast %34 : vector<16x1xf32> to vector<16x128xf32>
    %85 = arith.addf %83, %84 : vector<16x128xf32>
    %86 = vector.extract_strided_slice %30 {offsets = [3, 0, 0], sizes = [1, 16, 128], strides = [1, 1, 1]} : vector<4x16x128xbf16> to vector<1x16x128xbf16>
    %87 = vector.shape_cast %86 : vector<1x16x128xbf16> to vector<16x128xbf16>
    %cst_36 = arith.constant dense<0.000000e+00> : vector<64x128xf32>
    %88 = tpu.matmul %31, %87, %cst_36 {dimension_numbers = #tpu.dot_dimension_numbers<[0], [0], [1], [1], [0, 1, 1, 1], [], []>} : vector<16x64xbf16>, vector<16x128xbf16>, vector<64x128xf32> -> vector<64x128xf32>
    %89 = vector.broadcast %33 : vector<64x1xf32> to vector<64x128xf32>
    %90 = arith.addf %88, %89 : vector<64x128xf32>
    %cst_37 = arith.constant 5.000000e-01 : f32
    %91 = vector.broadcast %cst_37 : f32 to vector<64x128xf32>
    %92 = arith.mulf %91, %90 : vector<64x128xf32>
    %cst_38 = arith.constant 0.707106769 : f32
    %93 = vector.broadcast %cst_38 : f32 to vector<64x128xf32>
    %94 = arith.mulf %90, %93 : vector<64x128xf32>
    %95 = math.erf %94 : vector<64x128xf32>
    %cst_39 = arith.constant 1.000000e+00 : f32
    %96 = vector.broadcast %cst_39 : f32 to vector<64x128xf32>
    %97 = arith.addf %96, %95 : vector<64x128xf32>
    %98 = arith.mulf %92, %97 : vector<64x128xf32>
    %99 = arith.truncf %98 : vector<64x128xf32> to vector<64x128xbf16>
    %cst_40 = arith.constant dense<0.000000e+00> : vector<16x128xf32>
    %100 = tpu.matmul %32, %99, %cst_40 {dimension_numbers = #tpu.dot_dimension_numbers<[0], [0], [1], [1], [0, 1, 1, 1], [], []>} : vector<64x16xbf16>, vector<64x128xbf16>, vector<16x128xf32> -> vector<16x128xf32>
    %101 = vector.broadcast %34 : vector<16x1xf32> to vector<16x128xf32>
    %102 = arith.addf %100, %101 : vector<16x128xf32>
    %103 = vector.shape_cast %51 : vector<16x128xf32> to vector<1x16x128xf32>
    %104 = vector.shape_cast %68 : vector<16x128xf32> to vector<1x16x128xf32>
    %105 = vector.shape_cast %85 : vector<16x128xf32> to vector<1x16x128xf32>
    %106 = vector.shape_cast %102 : vector<16x128xf32> to vector<1x16x128xf32>
    %107 = tpu.concatenate %103, %104, %105, %106 in 0 : vector<1x16x128xf32>, vector<1x16x128xf32>, vector<1x16x128xf32>, vector<1x16x128xf32> -> vector<4x16x128xf32>
    %108 = arith.addf %3, %107 : vector<4x16x128xf32>
    %109 = vector.shape_cast %108 : vector<4x16x128xf32> to vector<64x128xf32>
    %c0_41 = arith.constant 0 : index
    %c0_42 = arith.constant 0 : index
    %110 = vector.load %arg9[%c0_41, %c0_42] : memref<1x128xf32, #tpu.memory_space<vmem>>, vector<1x128xf32>
    %c0_43 = arith.constant 0 : index
    %c0_44 = arith.constant 0 : index
    %111 = vector.load %arg10[%c0_43, %c0_44] : memref<1x128xf32, #tpu.memory_space<vmem>>, vector<1x128xf32>
    %cst_45 = arith.constant dense<0.000000e+00> : vector<64xf32>
    %112 = vector.multi_reduction <add>, %109, %cst_45 [1] : vector<64x128xf32> to vector<64xf32>
    %113 = vector.shape_cast %112 : vector<64xf32> to vector<64x1xf32>
    %cst_46 = arith.constant 1.280000e+02 : f32
    %114 = vector.broadcast %cst_46 : f32 to vector<64x1xf32>
    %115 = arith.divf %113, %114 : vector<64x1xf32>
    %116 = vector.broadcast %115 : vector<64x1xf32> to vector<64x128xf32>
    %117 = arith.subf %109, %116 : vector<64x128xf32>
    %118 = arith.mulf %117, %117 : vector<64x128xf32>
    %cst_47 = arith.constant dense<0.000000e+00> : vector<64xf32>
    %119 = vector.multi_reduction <add>, %118, %cst_47 [1] : vector<64x128xf32> to vector<64xf32>
    %120 = vector.shape_cast %119 : vector<64xf32> to vector<64x1xf32>
    %cst_48 = arith.constant 1.280000e+02 : f32
    %121 = vector.broadcast %cst_48 : f32 to vector<64x1xf32>
    %122 = arith.divf %120, %121 : vector<64x1xf32>
    %123 = vector.broadcast %115 : vector<64x1xf32> to vector<64x128xf32>
    %124 = arith.subf %109, %123 : vector<64x128xf32>
    %cst_49 = arith.constant 9.99999974E-6 : f32
    %125 = vector.broadcast %cst_49 : f32 to vector<64x1xf32>
    %126 = arith.addf %122, %125 : vector<64x1xf32>
    %127 = math.rsqrt %126 : vector<64x1xf32>
    %128 = vector.broadcast %127 : vector<64x1xf32> to vector<64x128xf32>
    %129 = arith.mulf %124, %128 : vector<64x128xf32>
    %130 = vector.broadcast %110 : vector<1x128xf32> to vector<64x128xf32>
    %131 = arith.mulf %129, %130 : vector<64x128xf32>
    %132 = vector.broadcast %111 : vector<1x128xf32> to vector<64x128xf32>
    %133 = arith.addf %131, %132 : vector<64x128xf32>
    %134 = arith.truncf %133 : vector<64x128xf32> to vector<64x128xbf16>
    %c0_50 = arith.constant 0 : index
    %c0_51 = arith.constant 0 : index
    %135 = vector.load %arg11[%c0_50, %c0_51] : memref<128x256xbf16, #tpu.memory_space<vmem>>, vector<128x256xbf16>
    %cst_52 = arith.constant dense<0.000000e+00> : vector<64x256xf32>
    %136 = tpu.matmul %134, %135, %cst_52 {dimension_numbers = #tpu.dot_dimension_numbers<[1], [0], [0], [1], [0, 0, 1, 1], [], []>} : vector<64x128xbf16>, vector<128x256xbf16>, vector<64x256xf32> -> vector<64x256xf32>
    %c0_53 = arith.constant 0 : index
    %c0_54 = arith.constant 0 : index
    %137 = vector.load %arg12[%c0_53, %c0_54] : memref<1x256xf32, #tpu.memory_space<vmem>>, vector<1x256xf32>
    %138 = vector.broadcast %137 : vector<1x256xf32> to vector<64x256xf32>
    %139 = arith.addf %136, %138 : vector<64x256xf32>
    %cst_55 = arith.constant 5.000000e-01 : f32
    %140 = vector.broadcast %cst_55 : f32 to vector<64x256xf32>
    %141 = arith.mulf %140, %139 : vector<64x256xf32>
    %cst_56 = arith.constant 0.707106769 : f32
    %142 = vector.broadcast %cst_56 : f32 to vector<64x256xf32>
    %143 = arith.mulf %139, %142 : vector<64x256xf32>
    %144 = math.erf %143 : vector<64x256xf32>
    %cst_57 = arith.constant 1.000000e+00 : f32
    %145 = vector.broadcast %cst_57 : f32 to vector<64x256xf32>
    %146 = arith.addf %145, %144 : vector<64x256xf32>
    %147 = arith.mulf %141, %146 : vector<64x256xf32>
    %148 = arith.truncf %147 : vector<64x256xf32> to vector<64x256xbf16>
    %c0_58 = arith.constant 0 : index
    %c0_59 = arith.constant 0 : index
    %149 = vector.load %arg13[%c0_58, %c0_59] : memref<256x128xbf16, #tpu.memory_space<vmem>>, vector<256x128xbf16>
    %cst_60 = arith.constant dense<0.000000e+00> : vector<64x128xf32>
    %150 = tpu.matmul %148, %149, %cst_60 {dimension_numbers = #tpu.dot_dimension_numbers<[1], [0], [0], [1], [0, 0, 1, 1], [], []>} : vector<64x256xbf16>, vector<256x128xbf16>, vector<64x128xf32> -> vector<64x128xf32>
    %c0_61 = arith.constant 0 : index
    %c0_62 = arith.constant 0 : index
    %151 = vector.load %arg14[%c0_61, %c0_62] : memref<1x128xf32, #tpu.memory_space<vmem>>, vector<1x128xf32>
    %152 = vector.broadcast %151 : vector<1x128xf32> to vector<64x128xf32>
    %153 = arith.addf %150, %152 : vector<64x128xf32>
    %154 = arith.addf %109, %153 : vector<64x128xf32>
    %155 = vector.shape_cast %154 : vector<64x128xf32> to vector<4x16x128xf32>
    %c0_63 = arith.constant 0 : index
    %c0_64 = arith.constant 0 : index
    %c0_65 = arith.constant 0 : index
    %156 = vector.load %arg15[%c0_63, %c0_64, %c0_65] : memref<4x16x128xf32, #tpu.memory_space<vmem>>, vector<4x16x128xf32>
    tpu.vector_store %arg15[%c0_63, %c0_64, %c0_65], %155 {strides = array<i32>} : memref<4x16x128xf32, #tpu.memory_space<vmem>>, vector<4x16x128xf32>,
    return
  }
  func.func @transform_0(%arg0: i32) -> (i32, i32, i32) {
    %c0_i32 = arith.constant 0 : i32
    %c0_i32_0 = arith.constant 0 : i32
    %c0_i32_1 = arith.constant 0 : i32
    return %arg0, %c0_i32, %c0_i32_0 : i32, i32, i32
  }
  func.func @transform_1(%arg0: i32) -> (i32, i32, i32) {
    %c0_i32 = arith.constant 0 : i32
    %c0_i32_0 = arith.constant 0 : i32
    %c0_i32_1 = arith.constant 0 : i32
    return %arg0, %c0_i32, %c0_i32_0 : i32, i32, i32
  }
  func.func @transform_2(%arg0: i32) -> (i32, i32) {
    %c0_i32 = arith.constant 0 : i32
    %c0_i32_0 = arith.constant 0 : i32
    %c0_i32_1 = arith.constant 0 : i32
    return %c0_i32, %c0_i32_0 : i32, i32
  }
  func.func @transform_3(%arg0: i32) -> (i32, i32) {
    %c0_i32 = arith.constant 0 : i32
    %c0_i32_0 = arith.constant 0 : i32
    %c0_i32_1 = arith.constant 0 : i32
    return %c0_i32, %c0_i32_0 : i32, i32
  }
  func.func @transform_4(%arg0: i32) -> (i32, i32) {
    %c0_i32 = arith.constant 0 : i32
    %c0_i32_0 = arith.constant 0 : i32
    %c0_i32_1 = arith.constant 0 : i32
    return %c0_i32, %c0_i32_0 : i32, i32
  }
  func.func @transform_5(%arg0: i32) -> (i32, i32) {
    %c0_i32 = arith.constant 0 : i32
    %c0_i32_0 = arith.constant 0 : i32
    %c0_i32_1 = arith.constant 0 : i32
    return %c0_i32, %c0_i32_0 : i32, i32
  }
  func.func @transform_6(%arg0: i32) -> (i32, i32) {
    %c0_i32 = arith.constant 0 : i32
    %c0_i32_0 = arith.constant 0 : i32
    %c0_i32_1 = arith.constant 0 : i32
    return %c0_i32, %c0_i32_0 : i32, i32
  }
  func.func @transform_7(%arg0: i32) -> (i32, i32) {
    %c0_i32 = arith.constant 0 : i32
    %c0_i32_0 = arith.constant 0 : i32
    %c0_i32_1 = arith.constant 0 : i32
    return %c0_i32, %c0_i32_0 : i32, i32
  }
  func.func @transform_8(%arg0: i32) -> (i32, i32) {
    %c0_i32 = arith.constant 0 : i32
    %c0_i32_0 = arith.constant 0 : i32
    %c0_i32_1 = arith.constant 0 : i32
    return %c0_i32, %c0_i32_0 : i32, i32
  }
  func.func @transform_9(%arg0: i32) -> (i32, i32) {
    %c0_i32 = arith.constant 0 : i32
    %c0_i32_0 = arith.constant 0 : i32
    %c0_i32_1 = arith.constant 0 : i32
    return %c0_i32, %c0_i32_0 : i32, i32
  }
  func.func @transform_10(%arg0: i32) -> (i32, i32) {
    %c0_i32 = arith.constant 0 : i32
    %c0_i32_0 = arith.constant 0 : i32
    %c0_i32_1 = arith.constant 0 : i32
    return %c0_i32, %c0_i32_0 : i32, i32
  }
  func.func @transform_11(%arg0: i32) -> (i32, i32) {
    %c0_i32 = arith.constant 0 : i32
    %c0_i32_0 = arith.constant 0 : i32
    %c0_i32_1 = arith.constant 0 : i32
    return %c0_i32, %c0_i32_0 : i32, i32
  }
  func.func @transform_12(%arg0: i32) -> (i32, i32) {
    %c0_i32 = arith.constant 0 : i32
    %c0_i32_0 = arith.constant 0 : i32
    %c0_i32_1 = arith.constant 0 : i32
    return %c0_i32, %c0_i32_0 : i32, i32
  }
  func.func @transform_13(%arg0: i32) -> (i32, i32) {
    %c0_i32 = arith.constant 0 : i32
    %c0_i32_0 = arith.constant 0 : i32
    %c0_i32_1 = arith.constant 0 : i32
    return %c0_i32, %c0_i32_0 : i32, i32
  }
  func.func @transform_14(%arg0: i32) -> (i32, i32, i32) {
    %c0_i32 = arith.constant 0 : i32
    %c0_i32_0 = arith.constant 0 : i32
    %c0_i32_1 = arith.constant 0 : i32
    return %arg0, %c0_i32, %c0_i32_0 : i32, i32, i32
  }
}

</mosaic_0001>

<bundles_post_ra>
// kernel: tpu_custom_call.1
= control target key start
LH: loop header
LB: loop body
LE: loop exit
PB: predicated region body
PF: predicated region fallthrough
CT: control target
= control target key end

     0   :  { %s4651_s0 = inlined_call_operand.hbm [shape: f32[8,16,128], index: 0, kind: input, shape index: {}]   ;;  %s4652_s1 = inlined_call_operand.hbm [shape: f32[8,16,1], index: 1, kind: input, shape index: {}]   ;;  %s4653_s2 = inlined_call_operand.hbm [shape: f32[1,128], index: 2, kind: input, shape index: {}]   ;;  %s4654_s3 = inlined_call_operand.hbm [shape: f32[1,128], index: 3, kind: input, shape index: {}]   ;;  %s4655_s4 = inlined_call_operand.hbm [shape: bf16[16,64], index: 4, kind: input, shape index: {}]   ;;  %s4656_s5 = inlined_call_operand.hbm [shape: f32[64,1], index: 5, kind: input, shape index: {}]   ;;  %s4657_s6 = inlined_call_operand.hbm [shape: bf16[64,16], index: 6, kind: input, shape index: {}]   ;;  %s4658_s7 = inlined_call_operand.hbm [shape: f32[16,1], index: 7, kind: input, shape index: {}]   ;;  %s4659_s8 = inlined_call_operand.hbm [shape: f32[1,128], index: 8, kind: input, shape index: {}]   ;;  %s4660_s9 = inlined_call_operand.hbm [shape: f32[1,128], index: 9, kind: input, shape index: {}]   ;;  %s4661_s10 = inlined_call_operand.hbm [shape: bf16[128,256], index: 10, kind: input, shape index: {}]   ;;  %s4662_s11 = inlined_call_operand.hbm [shape: f32[1,256], index: 11, kind: input, shape index: {}]   ;;  %s4663_s12 = inlined_call_operand.hbm [shape: bf16[256,128], index: 12, kind: input, shape index: {}]   ;;  %s4664_s13 = inlined_call_operand.hbm [shape: f32[1,128], index: 13, kind: input, shape index: {}]   ;;  %s4665_s14 = inlined_call_operand.hbm [shape: f32[8,16,128], index: 14, kind: output, shape index: {}]  }
   0x1   :  { %4680 = sst [smem:[#allocation39_spill]] %s4651_s0 }
   0x2   :  { %4681 = sst [smem:[#allocation40_spill]] %s4652_s1 }
   0x3   :  { %4682 = sst [smem:[#allocation41_spill]] %s4653_s2 }
   0x4   :  { %4683 = sst [smem:[#allocation42_spill]] %s4654_s3 }
   0x5   :  { %4684 = sst [smem:[#allocation43_spill]] %s4655_s4 }
   0x6   :  { %4685 = sst [smem:[#allocation44_spill]] %s4656_s5 }
   0x7   :  { %4686 = sst [smem:[#allocation45_spill]] %s4657_s6 }
   0x8   :  { %4687 = sst [smem:[#allocation46_spill]] %s4658_s7 }
   0x9   :  { %4688 = sst [smem:[#allocation47_spill]] %s4659_s8 }
   0xa   :  { %4689 = sst [smem:[#allocation48_spill]] %s4660_s9 }
   0xb   :  { %4690 = sst [smem:[#allocation49_spill]] %s4665_s14 }
   0xc   :  { %19 = vsyncpa [#allocation3], 0 }
   0xd   :  { %21 = vsyncpa [#allocation3 + $0x1], 0 }
   0xe   :  { %22 = vsyncpa [#allocation6], 0 }
   0xf   :  { %24 = vsyncpa [#allocation6 + $0x1], 0 }
  0x10   :  { %25 = vsyncpa [#allocation9], 0 }
  0x11   :  { %26 = vsyncpa [#allocation12], 0 }
  0x12   :  { %27 = vsyncpa [#allocation15], 0 }
  0x13   :  { %28 = vsyncpa [#allocation18], 0 }
  0x14   :  { %29 = vsyncpa [#allocation21], 0 }
  0x15   :  { %30 = vsyncpa [#allocation24], 0 }
  0x16   :  { %31 = vsyncpa [#allocation4], 0 }
  0x17   :  { %33 = vsyncpa [#allocation4 + $0x1], 0  ;;  %s3702_s29 = smov 0   ;;  %s3704_s30 = smov 0  }
  0x18   :  { %s3706_s15 = smov 0   ;;  %s3708_s16 = smov 0  }
  0x19 LB: > { %4691 = sst [smem:[#allocation36_spill]] %s3589_s29  ;;  %s3603_s17 = smov [#allocation7]   ;;  %s3601_s16 = sphi %s3708_s16, %s4742_s16   ;;  %s3597_s15 = sphi %s3706_s15, %s4741_s15   ;;  %s3593_s30 = sphi %s3704_s30, %s4740_s30   ;;  %s3589_s29 = sphi %s3702_s29, %s4739_s29  }
  0x1a   : > { %s387_s18 = sshll.u32 %s3603_s17, 4  ;;  %s3723_s19 = sadd.s32 4294967295, %s3601_s16   ;;  %s3728_s18 = int_to_ptr.vmem [resolvable:$true] %s387_s18 }
  0x1b   : > { %4692 = sst [smem:[#allocation37_spill]] %s3723_s19  ;;  %p2471_p0 = scmp.ge.s32.totalorder %s3601_s16, 1 }
  0x1c   : > { %p4673_p1 = scmp.eq.s32.totalorder %s3723_s19, 0  ;;  %p374_p2 = scmp.lt.s32.totalorder %s3601_s16, 3 }
  0x1d   : > { %s3604_s21 = smov [#allocation8]   ;;  %s3605_s23 = smov [#allocation11]  }
  0x1e   : > { %p3730_p3 = pnand %p2471_p0, %p374_p2  ;;  %s398_s22 = sshll.u32 %s3604_s21, 4  ;;  %s3737_s22 = int_to_ptr.vmem [resolvable:$true] %s398_s22 }
  0x1f   : > { %s421_s24 = sshll.u32 %s3605_s23, 4  ;;  %s4696_s2 = sld [smem:[#allocation41_spill]]  ;;  %s3745_s24 = int_to_ptr.vmem [resolvable:$true] %s421_s24 }
  0x20   : > { %s4693_s20 = scalar_select %p3730_p3, 1, 0 }
  0x21   : > { %p2805_p5 = pneg %p3730_p3 }
  0x22   : > { %4694 = sst [smem:[#allocation38_spill]] %s4693_s20 }
  0x23   : > { %p3741_p6 = pnand %p2805_p5, %p4673_p1 }
  0x25   : > { %s3107_s28 = scalar_lea.hbm %s4696_s2, 16  ;;  %p3755_p8 = pneg %p3741_p6 }
  0x26   : > { %p3108_p7 = scmp.ne.s32.totalorder %s4696_s2, %s3107_s28  ;;  %p3114_p11 = scmp.lt.u32.totalorder %s3107_s28, %s4696_s2 }
  0x28   : > { %p3110_p9 = pnand %p3755_p8, %p3108_p7 }
  0x2a   : > { %p3111_p10 = pneg %p3110_p9 }
  0x2c   : > { %p3116_p12 = pnand %p3114_p11, %p3111_p10 }
  0x2e   : > { %3119 = shalt.err (!%p3116_p12)
}
  0x2f   : > { %s3120_s14 = scalar_lea.vmem %s3728_s18, 16  ;;  %s3127_s26 = scalar_lea.vmem %s3728_s18, 32 }
  0x30   : > { %p3121_p13 = scmp.ne.s32.totalorder %s3728_s18, %s3120_s14  ;;  %p3128_p5 = scmp.lt.s32.totalorder %s3728_s18, %s3728_s18 }
  0x31   : > { %p3129_p7 = scmp.lt.s32.totalorder %s3127_s26, %s3120_s14 }
  0x32   : > { %p3123_p0 = pnand %p3121_p13, %p3755_p8 }
  0x33   : > { %p3130_p9 = por %p3129_p7, %p3128_p5 }
  0x34   : > { %p3124_p2 = pneg %p3123_p0 }
  0x36   : > { %p3131_p4 = pnand %p3130_p9, %p3124_p2 }
  0x38   : > { %3134 = shalt.err (!%p3131_p4)
}
  0x39   : > { %2808 = dma.hbm_to_vmem [thread:$0]  (!%p3741_p6), %s4696_s2, 16, %s3728_s18, [#allocation6]  }
  0x3a   : > { %s4698_s3 = sld [smem:[#allocation42_spill]] }
  0x40   : > { %s3135_s23 = scalar_lea.hbm %s4698_s3, 16 }
  0x41   : > { %p3136_p10 = scmp.ne.s32.totalorder %s4698_s3, %s3135_s23  ;;  %p3142_p4 = scmp.lt.u32.totalorder %s3135_s23, %s4698_s3 }
  0x43   : > { %p3138_p11 = pnand %p3136_p10, %p3755_p8 }
  0x45   : > { %p3139_p12 = pneg %p3138_p11 }
  0x47   : > { %p3144_p13 = pnand %p3142_p4, %p3139_p12 }
  0x49   : > { %3147 = shalt.err (!%p3144_p13)
}
  0x4a   : > { %s3148_s18 = scalar_lea.vmem %s3737_s22, 16  ;;  %s3155_s0 = scalar_lea.vmem %s3737_s22, 32 }
  0x4b   : > { %p3149_p0 = scmp.ne.s32.totalorder %s3737_s22, %s3148_s18  ;;  %p3156_p7 = scmp.lt.s32.totalorder %s3737_s22, %s3737_s22 }
  0x4c   : > { %p3157_p9 = scmp.lt.s32.totalorder %s3155_s0, %s3148_s18 }
  0x4d   : > { %p3151_p2 = pnand %p3149_p0, %p3755_p8 }
  0x4e   : > { %p3158_p10 = por %p3157_p9, %p3156_p7 }
  0x4f   : > { %p3152_p5 = pneg %p3151_p2 }
  0x51   : > { %p3159_p11 = pnand %p3158_p10, %p3152_p5 }
  0x53   : > { %3162 = shalt.err (!%p3159_p11)
}
  0x54   : > { %2811 = dma.hbm_to_vmem [thread:$0]  (!%p3741_p6), %s4698_s3, 16, %s3737_s22, [#allocation9]  }
  0x55   : > { %s4699_s5 = sld [smem:[#allocation44_spill]] }
  0x5b   : > { %s3163_s17 = scalar_lea.hbm %s4699_s5, 1024 }
  0x5c   : > { %p3164_p12 = scmp.ne.s32.totalorder %s4699_s5, %s3163_s17  ;;  %p3170_p0 = scmp.lt.u32.totalorder %s3163_s17, %s4699_s5 }
  0x5e   : > { %p3166_p4 = pnand %p3164_p12, %p3755_p8 }
  0x60   : > { %p3167_p13 = pneg %p3166_p4 }
  0x62   : > { %p3172_p2 = pnand %p3170_p0, %p3167_p13 }
  0x64   : > { %3175 = shalt.err (!%p3172_p2)
}
  0x65   : > { %s3176_s22 = scalar_lea.vmem %s3745_s24, 1024  ;;  %p3184_p10 = scmp.lt.s32.totalorder %s3745_s24, %s3745_s24 }
  0x66   : > { %p3177_p5 = scmp.ne.s32.totalorder %s3745_s24, %s3176_s22  ;;  %p3185_p11 = scmp.lt.s32.totalorder %s3176_s22, %s3176_s22 }
  0x68   : > { %p3179_p7 = pnand %p3177_p5, %p3755_p8  ;;  %p3186_p12 = por %p3185_p11, %p3184_p10 }
  0x6a   : > { %p3180_p9 = pneg %p3179_p7 }
  0x6c   : > { %p3187_p4 = pnand %p3186_p12, %p3180_p9 }
  0x6e   : > { %3190 = shalt.err (!%p3187_p4)
}
  0x6f   : > { %s4675_s0 = smov 128   ;;  %s4677_s1 = smov 8  }
  0x70   : > { %2817 = dma.hbm_to_vmem [thread:$0]  (!%p3741_p6), %s4699_s5, 1024, %s3745_s24, [#allocation12], %s4675_s0, %s4675_s0, %s4677_s1  }
  0x71   : > { %s3608_s28 = smov [#allocation14]   ;;  %s3609_s23 = smov [#allocation17]  }
  0x72   : > { %s447_s17 = sshll.u32 %s3608_s28, 4  ;;  %s472_s14 = sshll.u32 %s3609_s23, 4  ;;  %s448_s17 = int_to_ptr.vmem [resolvable:$true] %s447_s17  ;;  %s473_s14 = int_to_ptr.vmem [resolvable:$true] %s472_s14 }
  0x73   : > { %s4700_s7 = sld [smem:[#allocation46_spill]] }
  0x79   : > { %s3191_s22 = scalar_lea.hbm %s4700_s7, 256 }
  0x7a   : > { %p3192_p13 = scmp.ne.s32.totalorder %s4700_s7, %s3191_s22  ;;  %p3198_p5 = scmp.lt.u32.totalorder %s3191_s22, %s4700_s7 }
  0x7c   : > { %p3194_p0 = pnand %p3192_p13, %p3755_p8 }
  0x7e   : > { %p3195_p2 = pneg %p3194_p0 }
  0x80   : > { %p3200_p7 = pnand %p3198_p5, %p3195_p2 }
  0x82   : > { %3203 = shalt.err (!%p3200_p7)
}
  0x83   : > { %s3204_s24 = scalar_lea.vmem %s448_s17, 256  ;;  %p3212_p12 = scmp.lt.s32.totalorder %s448_s17, %s448_s17 }
  0x84   : > { %p3205_p9 = scmp.ne.s32.totalorder %s448_s17, %s3204_s24  ;;  %p3213_p4 = scmp.lt.s32.totalorder %s3204_s24, %s3204_s24 }
  0x86   : > { %p3207_p10 = pnand %p3205_p9, %p3755_p8  ;;  %p3214_p1 = por %p3213_p4, %p3212_p12 }
  0x88   : > { %p3208_p11 = pneg %p3207_p10 }
  0x8a   : > { %p3215_p3 = pnand %p3214_p1, %p3208_p11 }
  0x8c   : > { %3218 = shalt.err (!%p3215_p3)
}
  0x8d   : > { %2823 = dma.hbm_to_vmem [thread:$0]  (!%p3741_p6), %s4700_s7, 256, %s448_s17, [#allocation15], %s4675_s0, %s4675_s0, %s4677_s1  }
  0x8e   : > { %s4701_s9 = sld [smem:[#allocation48_spill]] }
  0x94   : > { %s3219_s20 = scalar_lea.hbm %s4701_s9, 16 }
  0x95   : > { %p3220_p1 = scmp.ne.s32.totalorder %s4701_s9, %s3219_s20  ;;  %p3226_p0 = scmp.lt.u32.totalorder %s3219_s20, %s4701_s9 }
  0x97   : > { %p3222_p3 = pnand %p3220_p1, %p3755_p8 }
  0x99   : > { %p3223_p13 = pneg %p3222_p3 }
  0x9b   : > { %p3228_p2 = pnand %p3226_p0, %p3223_p13 }
  0x9d   : > { %3231 = shalt.err (!%p3228_p2)
}
  0x9e   : > { %s3232_s18 = scalar_lea.vmem %s473_s14, 16  ;;  %s3239_s17 = scalar_lea.vmem %s473_s14, 32 }
  0x9f   : > { %p3233_p5 = scmp.ne.s32.totalorder %s473_s14, %s3232_s18  ;;  %p3240_p10 = scmp.lt.s32.totalorder %s473_s14, %s473_s14 }
  0xa0   : > { %p3241_p11 = scmp.lt.s32.totalorder %s3239_s17, %s3232_s18 }
  0xa1   : > { %p3235_p7 = pnand %p3233_p5, %p3755_p8 }
  0xa2   : > { %p3242_p12 = por %p3241_p11, %p3240_p10 }
  0xa3   : > { %p3236_p9 = pneg %p3235_p7 }
  0xa5   : > { %p3243_p4 = pnand %p3242_p12, %p3236_p9 }
  0xa7   : > { %3246 = shalt.err (!%p3243_p4)
}
  0xa8   : > { %2829 = dma.hbm_to_vmem [thread:$0]  (!%p3741_p6), %s4701_s9, 16, %s473_s14, [#allocation18]  }
  0xa9   : > { %s3610_s2 = smov [#allocation20]   ;;  %s3611_s29 = smov [#allocation10]  }
  0xaa   : > { %s496_s3 = sshll.u32 %s3610_s2, 4  ;;  %s408_s19 = sshll.u32 %s3611_s29, 4  ;;  %s497_s3 = int_to_ptr.vmem [resolvable:$true] %s496_s3  ;;  %s409_s19 = int_to_ptr.vmem [resolvable:$true] %s408_s19 }
  0xab   : > { %s3247_s28 = scalar_lea.hbm %s4662_s11, 32 }
  0xac   : > { %p3248_p1 = scmp.ne.s32.totalorder %s4662_s11, %s3247_s28  ;;  %p3254_p0 = scmp.lt.u32.totalorder %s3247_s28, %s4662_s11 }
  0xae   : > { %p3250_p3 = pnand %p3248_p1, %p3755_p8 }
  0xb0   : > { %p3251_p13 = pneg %p3250_p3 }
  0xb2   : > { %p3256_p2 = pnand %p3254_p0, %p3251_p13 }
  0xb4   : > { %3259 = shalt.err (!%p3256_p2)
}
  0xb5   : > { %s3260_s14 = scalar_lea.vmem %s497_s3, 32  ;;  %p3268_p10 = scmp.lt.s32.totalorder %s497_s3, %s497_s3 }
  0xb6   : > { %p3261_p5 = scmp.ne.s32.totalorder %s497_s3, %s3260_s14  ;;  %p3269_p11 = scmp.lt.s32.totalorder %s3260_s14, %s3260_s14 }
  0xb8   : > { %p3263_p7 = pnand %p3261_p5, %p3755_p8  ;;  %p3270_p12 = por %p3269_p11, %p3268_p10 }
  0xba   : > { %p3264_p9 = pneg %p3263_p7 }
  0xbc   : > { %p3271_p4 = pnand %p3270_p12, %p3264_p9 }
  0xbe   : > { %3274 = shalt.err (!%p3271_p4)
}
  0xbf   : > { %2835 = dma.hbm_to_vmem [thread:$0]  (!%p3741_p6), %s4662_s11, 32, %s497_s3, [#allocation21]  }
  0xc0   : > { %s4702_s4 = sld [smem:[#allocation43_spill]] }
  0xc6   : > { %s3275_s20 = scalar_lea.hbm %s4702_s4, 128 }
  0xc7   : > { %p3276_p1 = scmp.ne.s32.totalorder %s4702_s4, %s3275_s20  ;;  %p3282_p0 = scmp.lt.u32.totalorder %s3275_s20, %s4702_s4 }
  0xc9   : > { %p3278_p3 = pnand %p3276_p1, %p3755_p8 }
  0xcb   : > { %p3279_p13 = pneg %p3278_p3 }
  0xcd   : > { %p3284_p2 = pnand %p3282_p0, %p3279_p13 }
  0xcf   : > { %3287 = shalt.err (!%p3284_p2)
}
  0xd0   : > { %s3288_s18 = scalar_lea.vmem %s409_s19, 128  ;;  %p3296_p10 = scmp.lt.s32.totalorder %s409_s19, %s409_s19 }
  0xd1   : > { %p3289_p5 = scmp.ne.s32.totalorder %s409_s19, %s3288_s18  ;;  %p3297_p11 = scmp.lt.s32.totalorder %s3288_s18, %s3288_s18 }
  0xd3   : > { %p3291_p7 = pnand %p3289_p5, %p3755_p8  ;;  %p3298_p12 = por %p3297_p11, %p3296_p10 }
  0xd5   : > { %p3292_p9 = pneg %p3291_p7 }
  0xd7   : > { %p3299_p4 = pnand %p3298_p12, %p3292_p9 }
  0xd9   : > { %3302 = shalt.err (!%p3299_p4)
}
  0xda   : > { %s3612_s3 = smov 64   ;;  %s3613_s17 = smov 4  }
  0xdb   : > { %2814 = dma.hbm_to_vmem [thread:$0]  (!%p3741_p6), %s4702_s4, 128, %s409_s19, [#allocation9], %s3612_s3, %s3612_s3, %s3613_s17  }
  0xdc   : > { %s3614_s24 = smov [#allocation13]   ;;  %s3615_s29 = smov [#allocation16]  }
  0xdd   : > { %s434_s2 = sshll.u32 %s3614_s24, 4  ;;  %s461_s20 = sshll.u32 %s3615_s29, 4  ;;  %s435_s2 = int_to_ptr.vmem [resolvable:$true] %s434_s2  ;;  %s462_s20 = int_to_ptr.vmem [resolvable:$true] %s461_s20 }
  0xde   : > { %s4703_s6 = sld [smem:[#allocation45_spill]] }
  0xe4   : > { %s3303_s23 = scalar_lea.hbm %s4703_s6, 512 }
  0xe5   : > { %p3304_p1 = scmp.ne.s32.totalorder %s4703_s6, %s3303_s23  ;;  %p3310_p0 = scmp.lt.u32.totalorder %s3303_s23, %s4703_s6 }
  0xe7   : > { %p3306_p3 = pnand %p3304_p1, %p3755_p8 }
  0xe9   : > { %p3307_p13 = pneg %p3306_p3 }
  0xeb   : > { %p3312_p2 = pnand %p3310_p0, %p3307_p13 }
  0xed   : > { %3315 = shalt.err (!%p3312_p2)
}
  0xee   : > { %s3316_s19 = scalar_lea.vmem %s435_s2, 512  ;;  %p3324_p10 = scmp.lt.s32.totalorder %s435_s2, %s435_s2 }
  0xef   : > { %p3317_p5 = scmp.ne.s32.totalorder %s435_s2, %s3316_s19  ;;  %p3325_p11 = scmp.lt.s32.totalorder %s3316_s19, %s3316_s19 }
  0xf1   : > { %p3319_p7 = pnand %p3317_p5, %p3755_p8  ;;  %p3326_p12 = por %p3325_p11, %p3324_p10 }
  0xf3   : > { %p3320_p9 = pneg %p3319_p7 }
  0xf5   : > { %p3327_p4 = pnand %p3326_p12, %p3320_p9 }
  0xf7   : > { %3330 = shalt.err (!%p3327_p4)
}
  0xf8   : > { %2820 = dma.hbm_to_vmem [thread:$0]  (!%p3741_p6), %s4703_s6, 512, %s435_s2, [#allocation12], %s3612_s3, %s3612_s3, %s3613_s17  }
  0xf9   : > { %s4704_s8 = sld [smem:[#allocation47_spill]] }
  0xff   : > { %s3331_s24 = scalar_lea.hbm %s4704_s8, 16 }
 0x100   : > { %p3332_p1 = scmp.ne.s32.totalorder %s4704_s8, %s3331_s24  ;;  %p3338_p0 = scmp.lt.u32.totalorder %s3331_s24, %s4704_s8 }
 0x102   : > { %p3334_p3 = pnand %p3332_p1, %p3755_p8 }
 0x104   : > { %p3335_p13 = pneg %p3334_p3 }
 0x106   : > { %p3340_p2 = pnand %p3338_p0, %p3335_p13 }
 0x108   : > { %3343 = shalt.err (!%p3340_p2)
}
 0x109   : > { %s3344_s26 = scalar_lea.vmem %s462_s20, 16  ;;  %s3351_s2 = scalar_lea.vmem %s462_s20, 32 }
 0x10a   : > { %p3345_p5 = scmp.ne.s32.totalorder %s462_s20, %s3344_s26  ;;  %p3352_p10 = scmp.lt.s32.totalorder %s462_s20, %s462_s20 }
 0x10b   : > { %p3353_p11 = scmp.lt.s32.totalorder %s3351_s2, %s3344_s26 }
 0x10c   : > { %p3347_p7 = pnand %p3345_p5, %p3755_p8 }
 0x10d   : > { %p3354_p12 = por %p3353_p11, %p3352_p10 }
 0x10e   : > { %p3348_p9 = pneg %p3347_p7 }
 0x110   : > { %p3355_p4 = pnand %p3354_p12, %p3348_p9 }
 0x112   : > { %3358 = shalt.err (!%p3355_p4)
}
 0x113   : > { %2826 = dma.hbm_to_vmem [thread:$0]  (!%p3741_p6), %s4704_s8, 16, %s462_s20, [#allocation15]  }
 0x114   : > { %s3616_s0 = smov [#allocation19]   ;;  %s3617_s14 = smov [#allocation22]  }
 0x115   : > { %s482_s1 = sshll.u32 %s3616_s0, 4  ;;  %s506_s22 = sshll.u32 %s3617_s14, 4  ;;  %s483_s1 = int_to_ptr.vmem [resolvable:$true] %s482_s1  ;;  %s507_s22 = int_to_ptr.vmem [resolvable:$true] %s506_s22 }
 0x116   : > { %s3359_s27 = scalar_lea.hbm %s4661_s10, 2048 }
 0x117   : > { %p3360_p1 = scmp.ne.s32.totalorder %s4661_s10, %s3359_s27  ;;  %p3366_p0 = scmp.lt.u32.totalorder %s3359_s27, %s4661_s10 }
 0x119   : > { %p3362_p3 = pnand %p3360_p1, %p3755_p8 }
 0x11b   : > { %p3363_p13 = pneg %p3362_p3 }
 0x11d   : > { %p3368_p2 = pnand %p3366_p0, %p3363_p13 }
 0x11f   : > { %3371 = shalt.err (!%p3368_p2)
}
 0x120   : > { %s3372_s20 = scalar_lea.vmem %s483_s1, 2048  ;;  %p3380_p10 = scmp.lt.s32.totalorder %s483_s1, %s483_s1 }
 0x121   : > { %p3373_p5 = scmp.ne.s32.totalorder %s483_s1, %s3372_s20  ;;  %p3381_p11 = scmp.lt.s32.totalorder %s3372_s20, %s3372_s20 }
 0x123   : > { %p3375_p7 = pnand %p3373_p5, %p3755_p8  ;;  %p3382_p12 = por %p3381_p11, %p3380_p10 }
 0x125   : > { %p3376_p9 = pneg %p3375_p7 }
 0x127   : > { %p3383_p4 = pnand %p3382_p12, %p3376_p9 }
 0x129   : > { %3386 = shalt.err (!%p3383_p4)
}
 0x12a   : > { %s4705_s18 = smov 8   ;;  %s4706_s19 = smov 128  }
 0x12b   : > { %2832 = dma.hbm_to_vmem [thread:$0]  (!%p3741_p6), %s4661_s10, 2048, %s483_s1, [#allocation18], %s4706_s19, %s4706_s19, %s4705_s18  }
 0x12c   : > { %s3387_s27 = scalar_lea.hbm %s4663_s12, 2048 }
 0x12d   : > { %p3388_p1 = scmp.ne.s32.totalorder %s4663_s12, %s3387_s27  ;;  %p3394_p0 = scmp.lt.u32.totalorder %s3387_s27, %s4663_s12 }
 0x12f   : > { %p3390_p3 = pnand %p3388_p1, %p3755_p8 }
 0x131   : > { %p3391_p13 = pneg %p3390_p3 }
 0x133   : > { %p3396_p2 = pnand %p3394_p0, %p3391_p13 }
 0x135   : > { %3399 = shalt.err (!%p3396_p2)
}
 0x136   : > { %s3400_s20 = scalar_lea.vmem %s507_s22, 2048  ;;  %p3408_p10 = scmp.lt.s32.totalorder %s507_s22, %s507_s22 }
 0x137   : > { %p3401_p5 = scmp.ne.s32.totalorder %s507_s22, %s3400_s20  ;;  %p3409_p11 = scmp.lt.s32.totalorder %s3400_s20, %s3400_s20 }
 0x139   : > { %p3403_p7 = pnand %p3401_p5, %p3755_p8  ;;  %p3410_p12 = por %p3409_p11, %p3408_p10 }
 0x13b   : > { %p3404_p9 = pneg %p3403_p7 }
 0x13d   : > { %p3411_p4 = pnand %p3410_p12, %p3404_p9 }
 0x13f   : > { %3414 = shalt.err (!%p3411_p4)
}
 0x140   : > { %2838 = dma.hbm_to_vmem [thread:$0]  (!%p3741_p6), %s4663_s12, 2048, %s507_s22, [#allocation21], %s3612_s3, %s3612_s3, %s3613_s17  }
 0x141   : > { %s3618_s14 = smov [#allocation23]   ;;  %s3415_s28 = scalar_lea.hbm %s4664_s13, 16 }
 0x142   : > { %s520_s24 = sshll.u32 %s3618_s14, 4  ;;  %p3416_p1 = scmp.ne.s32.totalorder %s4664_s13, %s3415_s28  ;;  %s521_s24 = int_to_ptr.vmem [resolvable:$true] %s520_s24 }
 0x143   : > { %p3422_p0 = scmp.lt.u32.totalorder %s3415_s28, %s4664_s13 }
 0x144   : > { %p3418_p3 = pnand %p3416_p1, %p3755_p8 }
 0x146   : > { %p3419_p13 = pneg %p3418_p3 }
 0x148   : > { %p3424_p2 = pnand %p3422_p0, %p3419_p13 }
 0x14a   : > { %3427 = shalt.err (!%p3424_p2)
}
 0x14b   : > { %s3428_s3 = scalar_lea.vmem %s521_s24, 16  ;;  %s3435_s17 = scalar_lea.vmem %s521_s24, 32 }
 0x14c   : > { %p3429_p5 = scmp.ne.s32.totalorder %s521_s24, %s3428_s3  ;;  %p3436_p10 = scmp.lt.s32.totalorder %s521_s24, %s521_s24 }
 0x14d   : > { %p3437_p11 = scmp.lt.s32.totalorder %s3435_s17, %s3428_s3 }
 0x14e   : > { %p3431_p7 = pnand %p3429_p5, %p3755_p8 }
 0x14f   : > { %p3438_p12 = por %p3437_p11, %p3436_p10 }
 0x150   : > { %p3432_p9 = pneg %p3431_p7 }
 0x152   : > { %p3439_p4 = pnand %p3438_p12, %p3432_p9 }
 0x154   : > { %3442 = shalt.err (!%p3439_p4)
}
 0x155   : > { %s4707_s21 = sld [smem:[#allocation36_spill]]  ;;  %s4708_s0 = sld [smem:[#allocation37_spill]] }
 0x156   : > { %2841 = dma.hbm_to_vmem [thread:$0]  (!%p3741_p6), %s4664_s13, 16, %s521_s24, [#allocation24]  }
 0x157   : > { %s2470_s14 = sadd.s32 4294967294, %s3601_s16   ;;  %s4006_s25 = sadd.s32 1, %s3601_s16  }
 0x158   : > { %s43_s29 = ssub.s32 %s3601_s16, %s4006_s25  ;;  %s46_s27 = sadd.s32 1, %s3597_s15 }
 0x159   : > { %p44_p8 = scmp.eq.s32.totalorder %s43_s29, 0  ;;  %p53_p1 = scmp.ne.s32.totalorder %s3597_s15, %s3593_s30 }
 0x15a   : > { %p54_p3 = scmp.eq.s32.totalorder %s3601_s16, 0  ;;  %p367_p7 = scmp.eq.s32.totalorder %s2470_s14, 1 }
 0x15b   : > { %p59_p13 = scmp.ne.s32.totalorder %s3593_s30, %s4707_s21  ;;  %p4710_p2 = scmp.eq.s32.totalorder %s4708_s0, 0 }
 0x15c   : > { %s4017_s28 = scalar_select %p44_p8, %s3597_s15, %s46_s27  }
 0x15d   : > { %p4019_p0 = por %p54_p3, %p53_p1  ;;  %p4025_p6 = por %p4710_p2, %p59_p13 }
 0x15e   : > { %p361_p5 = scmp.eq.s32.totalorder %s4708_s0, 1  ;;  %p2865_p9 = scmp.lt.s32.totalorder %s3601_s16, 2 }
 0x15f   : > { %s531_s26 = sand.u32 1, %s3597_s15   ;;  %p4036_p11 = por %p367_p7, %p59_p13 }
 0x160   : > { %p4032_p10 = por %p361_p5, %p53_p1  ;;  %s2485_s3 = sshll.u32 %s531_s26, 6 }
 0x161   : > { %s4713_s20 = scalar_select %p4036_p11, 1, 0 }
 0x162   : > { %s4712_s2 = scalar_select %p4032_p10, 1, 0 }
 0x163   : > { %s2578_s17 = sshll.u32 %s3601_s16, 10  ;;  %s4714_s21 = sld [smem:[#allocation39_spill]] }
 0x164   : > { %s535_s0 = scalar_lea.vmem [#allocation2], %s2485_s3  ;;  %p4050_p12 = pnand %p2865_p9, %p4019_p0 }
 0x165   : > { %s543_s14 = sshll.u32 %s535_s0, 4  ;;  %s4716_s6 = sld [smem:[#allocation40_spill]]  ;;  %s4046_s14 = int_to_ptr.vmem [resolvable:$true] %s543_s14 }
 0x166   : > { %s557_s1 = scalar_lea.vmem [#allocation5], %s2485_s3  ;;  %s4061_s8 = scalar_lea.sflag [#allocation3], %s531_s26 }
 0x167   : > { %s4059_s7 = sshll.u32 %s557_s1, 4  ;;  %p3445_p8 = pneg %p4050_p12  ;;  %s4093_s7 = int_to_ptr.vmem [resolvable:$true] %s4059_s7 }
 0x169   : > { %s4044_s29 = scalar_lea.hbm %s4714_s21, %s2578_s17  ;;  %s3448_s4 = scalar_lea.hbm %s4714_s21, 2048 }
 0x16a   : > { %s3443_s0 = scalar_lea.hbm %s4044_s29, 1024  ;;  %p3449_p13 = scmp.lt.u32.totalorder %s4044_s29, %s4714_s21 }
 0x16b   : > { %s4057_s22 = scalar_lea.hbm %s4716_s6, %s2578_s17  ;;  %p3444_p4 = scmp.ne.s32.totalorder %s4044_s29, %s3443_s0 }
 0x16c   : > { %p3450_p0 = scmp.lt.u32.totalorder %s3448_s4, %s3443_s0  ;;  %p3452_p5 = scmp.lt.u32.totalorder %s3443_s0, %s4044_s29 }
 0x16d   : > { %p3446_p1 = pnand %p3445_p8, %p3444_p4 }
 0x16e   : > { %p3451_p2 = por %p3450_p0, %p3449_p13 }
 0x16f   : > { %p3447_p3 = pneg %p3446_p1 }
 0x170   : > { %p3453_p7 = por %p3452_p5, %p3451_p2 }
 0x172   : > { %p3454_p9 = pnand %p3453_p7, %p3447_p3 }
 0x174   : > { %3457 = shalt.err (!%p3454_p9)
}
 0x175   : > { %s3458_s26 = scalar_lea.vmem %s4046_s14, 1024  ;;  %s3619_s9 = smov [#allocation2]  }
 0x176   : > { %p3459_p4 = scmp.ne.s32.totalorder %s4046_s14, %s3458_s26  ;;  %s3463_s3 = sshll.u32 %s3619_s9, 4  ;;  %s3464_s3 = int_to_ptr.vmem [resolvable:$false] %s3463_s3 }
 0x177   : > { %s3465_s1 = scalar_lea.vmem %s3464_s3, 2048  ;;  %p3466_p10 = scmp.lt.s32.totalorder %s4046_s14, %s3464_s3 }
 0x178   : > { %p3461_p1 = pnand %p3459_p4, %p3445_p8  ;;  %p3467_p13 = scmp.lt.s32.totalorder %s3465_s1, %s3458_s26 }
 0x17a   : > { %p3462_p11 = pneg %p3461_p1  ;;  %p3468_p0 = por %p3467_p13, %p3466_p10 }
 0x17c   : > { %p3469_p2 = pnand %p3468_p0, %p3462_p11 }
 0x17e   : > { %3472 = shalt.err (!%p3469_p2)
}
 0x17f   : > { %2845 = dma.hbm_to_vmem [thread:$0]  (!%p4050_p12), %s4044_s29, 1024, %s4046_s14, %s4061_s8, %s4706_s19, %s4706_s19, %s4705_s18  }
 0x180   : > { %s553_s0 = sand.u32 1, %s3601_s16   ;;  %s3473_s4 = scalar_lea.hbm %s4057_s22, 1024 }
 0x181   : > { %s4096_s23 = scalar_lea.sflag [#allocation6], %s553_s0  ;;  %p3474_p10 = scmp.ne.s32.totalorder %s4057_s22, %s3473_s4 }
 0x182   : > { %s3478_s26 = scalar_lea.hbm %s4716_s6, 2048  ;;  %p3479_p5 = scmp.lt.u32.totalorder %s4057_s22, %s4716_s6 }
 0x183   : > { %p3476_p11 = pnand %p3474_p10, %p3445_p8  ;;  %p3480_p7 = scmp.lt.u32.totalorder %s3478_s26, %s3473_s4 }
 0x184   : > { %p3482_p4 = scmp.lt.u32.totalorder %s3473_s4, %s4057_s22 }
 0x185   : > { %p3477_p3 = pneg %p3476_p11  ;;  %p3481_p9 = por %p3480_p7, %p3479_p5 }
 0x187   : > { %p3483_p1 = por %p3482_p4, %p3481_p9 }
 0x189   : > { %p3484_p13 = pnand %p3483_p1, %p3477_p3 }
 0x18b   : > { %3487 = shalt.err (!%p3484_p13)
}
 0x18c   : > { %s3488_s8 = scalar_lea.vmem %s4093_s7, 1024  ;;  %s3620_s29 = smov [#allocation5]  }
 0x18d   : > { %p3489_p0 = scmp.ne.s32.totalorder %s4093_s7, %s3488_s8  ;;  %s3493_s14 = sshll.u32 %s3620_s29, 4  ;;  %s3494_s14 = int_to_ptr.vmem [resolvable:$false] %s3493_s14 }
 0x18e   : > { %s3495_s1 = scalar_lea.vmem %s3494_s14, 2048  ;;  %p3496_p11 = scmp.lt.s32.totalorder %s4093_s7, %s3494_s14 }
 0x18f   : > { %p3491_p2 = pnand %p3489_p0, %p3445_p8  ;;  %p3497_p5 = scmp.lt.s32.totalorder %s3495_s1, %s3488_s8 }
 0x191   : > { %p3492_p10 = pneg %p3491_p2  ;;  %p3498_p7 = por %p3497_p5, %p3496_p11 }
 0x193   : > { %p3499_p9 = pnand %p3498_p7, %p3492_p10 }
 0x195   : > { %3502 = shalt.err (!%p3499_p9)
}
 0x196   : > { %2848 = dma.hbm_to_vmem [thread:$0]  (!%p4050_p12), %s4057_s22, 1024, %s4093_s7, %s4096_s23, %s4706_s19, %s4706_s19, %s4705_s18  }
 0x197   : > { %s4717_s0 = sld [smem:[#allocation38_spill]] }
 0x19d   : > { %p4718_p8 = scmp.ne.s32.totalorder %s4717_s0, 0 }
 0x19e   : > { %s4128_s4 = sand.u32 (!%p4718_p8), 1, %s3593_s30  }
 0x19f   : > { %577 = sbr.rel (%p4718_p8) target bundleno = 2558 (0x9fe), region = 76  ;;  %s4131_s5 = sshll.u32 (!%p4718_p8), %s4128_s4, 6 }
 0x1a0   : > { %s580_s27 = scalar_lea.sflag (!%p4718_p8), [#allocation3], %s4128_s4  ;;  %s4135_s17 = scalar_lea.vmem (!%p4718_p8), [#allocation2], %s4131_s5 }
 0x1a6   : > { %3548 = dma.done.wait (%p4025_p6), %s580_s27, 1024  }
 0x1a7   : > { %3550 = vsyncadd (%p4025_p6), %s580_s27, 4294966272  ;;  %s4719_s7 = sld [smem:[#allocation37_spill]]  ;;  %s4143_s22 = scalar_lea.vmem [#allocation5], %s4131_s5 }
 0x1ad   : > { %s588_s18 = sand.u32 1, %s4719_s7  }
 0x1ae   : > { %s589_s19 = scalar_lea.sflag [#allocation6], %s588_s18 }
 0x1af   : > { %3552 = dma.done.wait (%p4025_p6), %s589_s19, 1024  }
 0x1b0   : > { %3554 = vsyncadd (%p4025_p6), %s589_s19, 4294966272  ;;  %p4720_p12 = scmp.eq.s32.totalorder %s4719_s7, 0 }
 0x1b2   : > { %3556 = dma.done.wait (%p4720_p12), [#allocation6], 16   ;;  %p4721_p3 = pmov %p4720_p12 }
 0x1b4   : > { %3558 = vsyncadd (%p4721_p3), [#allocation6], 4294967280  ;;  %p4722_p4 = pmov %p4721_p3 }
 0x1b5   : > { %p4723_p1 = pmov %p4721_p3 }
 0x1b6   : > { %3560 = dma.done.wait (%p4722_p4), [#allocation9], 144  }
 0x1b7   : > { %3562 = vsyncadd (%p4723_p1), [#allocation9], 4294967152  ;;  %p4724_p13 = pmov %p4723_p1 }
 0x1b8   : > { %p4725_p0 = pmov %p4723_p1 }
 0x1b9   : > { %3564 = dma.done.wait (%p4724_p13), [#allocation12], 1536  }
 0x1ba   : > { %3566 = vsyncadd (%p4725_p0), [#allocation12], 4294965760  ;;  %p4726_p6 = pmov %p4725_p0 }
 0x1bb   : > { %p4727_p2 = pmov %p4725_p0 }
 0x1bc   : > { %3568 = dma.done.wait (%p4726_p6), [#allocation15], 272  }
 0x1bd   : > { %3570 = vsyncadd (%p4727_p2), [#allocation15], 4294967024  ;;  %p4728_p10 = pmov %p4725_p0 }
 0x1be   : > { %p4729_p11 = pmov %p4725_p0 }
 0x1bf   : > { %3572 = dma.done.wait (%p4728_p10), [#allocation18], 2064  }
 0x1c0   : > { %3574 = vsyncadd (%p4729_p11), [#allocation18], 4294965232  ;;  %p4730_p5 = pmov %p4725_p0 }
 0x1c1   : > { %p4731_p7 = pmov %p4725_p0 }
 0x1c2   : > { %3576 = dma.done.wait (%p4730_p5), [#allocation21], 2080  }
 0x1c3   : > { %3578 = vsyncadd (%p4731_p7), [#allocation21], 4294965216  ;;  %p4732_p9 = pmov %p4725_p0 }
 0x1c4   : > { %p4733_p8 = pmov %p4725_p0 }
 0x1c5   : > { %3580 = dma.done.wait (%p4732_p9), [#allocation24], 16  }
 0x1c6   : > { %3582 = vsyncadd (%p4733_p8), [#allocation24], 4294967280  ;;  %v3621_v0 = vmov 0   ;;  %v702_v1 = vld [vmem:[%s4143_s22] sm:$0xff]  ;;  %v703_v2 = vld [vmem:[%s4143_s22 + $0x8] sm:$0xff]  ;;  %vm963_vm0 = vcmask 130048  }
 0x1c7   : > { %2932 = vset.pattern.permute.xlu0 %v3621_v0  ;;  %v694_v3 = vld [vmem:[%s4135_s17] sm:$0xff]  ;;  %v695_v6 = vld [vmem:[%s4135_s17 + $0x8] sm:$0xff]  ;;  %v704_v17 = vld [vmem:[%s4143_s22 + $0x10] sm:$0xff]  ;;  %vm3623_vm1 = vmmov 0   ;;  %vm1135_vm2 = vcmask 523264   ;;  %s4583_s24 = scalar_lea.vmem [#allocation25], %s4131_s5 }
 0x1c8   : > { %712 = vperm.xlu0 %2932, %v702_v1   ;;  %v706_v18 = vld [vmem:[%s4143_s22 + $0x20] sm:$0xff]  ;;  %v707_v19 = vld [vmem:[%s4143_s22 + $0x28] sm:$0xff]  ;;  %v708_v20 = vld [vmem:[%s4143_s22 + $0x30] sm:$0xff]  ;;  %s2582_s23 = sshll.u32 %s4719_s7, 10  ;;  %s2260_s26 = sshll.u32 %s4583_s24, 4  ;;  %s4604_s26 = int_to_ptr.vmem [resolvable:$true] %s2260_s26 }
 0x1c9   : > { %v709_v21 = vld [vmem:[%s4143_s22 + $0x38] sm:$0xff]  ;;  %v2934_v22 = vld [vmem:[#allocation10] sm:$0xff]   ;;  %v696_v29 = vld [vmem:[%s4135_s17 + $0x10] sm:$0xff]  ;;  %s4734_s8 = sld [smem:[#allocation49_spill]]  ;;  %s2246_s14 = scalar_lea.sflag [#allocation4], %s4128_s4 }
 0x1ca   : > { %v705_v23 = vld [vmem:[%s4143_s22 + $0x18] sm:$0xff]  ;;  %v699_v35 = vld [vmem:[%s4135_s17 + $0x28] sm:$0xff]  ;;  %v4210_v40 = vld [vmem:[#allocation7] ss:$0 sm:$0xff]  ;;  %s3503_s1 = scalar_lea.vmem %s4604_s26, 1024  ;;  %p4735_p3 = scmp.ne.s32.totalorder %s4712_s2, 0 }
 0x1cb   : > { %v4214_v45 = vld [vmem:[#allocation8] ss:$0 sm:$0xff]  ;;  %v701_v46 = vld [vmem:[%s4135_s17 + $0x38] sm:$0xff]  ;;  %v895_v59 = vld [vmem:[#allocation11 + $0x20] sm:$0xff]  ;;  %p3504_p12 = scmp.ne.s32.totalorder %s4604_s26, %s3503_s1  ;;  %s3624_s0 = smov [#allocation25]  }
 0x1cc   : > { %717 = vperm.xlu0 %2932, %v703_v2   ;;  %v892_v56 = vld [vmem:[#allocation11 + $0x8] sm:$0xff]  ;;  %v893_v57 = vld [vmem:[#allocation11 + $0x10] sm:$0xff]  ;;  %s3507_s5 = sshll.u32 %s3624_s0, 4  ;;  %s3508_s5 = int_to_ptr.vmem [resolvable:$false] %s3507_s5 }
 0x1cd   : > { %v697_v58 = vld [vmem:[%s4135_s17 + $0x18] sm:$0xff]  ;;  %v698_v62 = vld [vmem:[%s4135_s17 + $0x20] sm:$0xff]  ;;  %v700_v1 = vld [vmem:[%s4135_s17 + $0x30] sm:$0xff]  ;;  %p3505_p4 = pnand %p3504_p12, %p4735_p3  ;;  %s3509_s27 = scalar_lea.vmem %s3508_s5, 2048 }
 0x1ce   : > { %p3510_p13 = scmp.lt.s32.totalorder %s4604_s26, %s3508_s5  ;;  %p3511_p0 = scmp.lt.s32.totalorder %s3509_s27, %s3503_s1 }
 0x1cf   : > { %s4602_s29 = scalar_lea.hbm %s4734_s8, %s2582_s23  ;;  %p3506_p1 = pneg %p3505_p4 }
 0x1d0   : > { %p3512_p6 = por %p3511_p0, %p3510_p13 }
 0x1d2   : > { %p3513_p2 = pnand %p3512_p6, %p3506_p1 }
 0x247   : > { %v713_v4 = vpop.permute.xlu0 %712 }
 0x248   : > { %v4181_v5 = vmul.f32 %v713_v4, %v694_v3  ;;  %v891_v3 = vld [vmem:[#allocation11] sm:$0xff]  ;;  %v894_v4 = vld [vmem:[#allocation11 + $0x18] sm:$0xff] }
 0x24a   : > { %760 = vadd.xlane.f32.xlu1 %v4181_v5 }
 0x24b   : > { %v718_v7 = vpop.permute.xlu0 %717 }
 0x24c   : > { %v4185_v8 = vmul.f32 %v718_v7, %v695_v6  ;;  %v896_v6 = vld [vmem:[#allocation11 + $0x28] sm:$0xff]  ;;  %v3622_v7 = vmov 0.0  }
 0x24e   : > { %762 = vadd.xlane.f32.xlu1 %v4185_v8 }
 0x2d7   : > { %v761_v9 = vpop.xlane.xlu1 %760 }
 0x2d8   : > { %v777_v10 = vmul.f32 0.0078125, %v761_v9 }
 0x2da   : > { %v785_v11 = vsub.f32 %v4181_v5, %v777_v10 }
 0x2db   : > { %v763_v12 = vpop.xlane.xlu1 %762 }
 0x2dc   : > { %v778_v13 = vmul.f32 0.0078125, %v763_v12  ;;  %v793_v14 = vmul.f32 %v785_v11, %v785_v11 }
 0x2de   : > { %v786_v15 = vsub.f32 %v4185_v8, %v778_v13  ;;  %801 = vadd.xlane.f32.xlu0 %v793_v14  ;;  %v897_v13 = vld [vmem:[#allocation11 + $0x30] sm:$0xff] }
 0x2e0   : > { %v794_v16 = vmul.f32 %v786_v15, %v786_v15 }
 0x2e2   : > { %803 = vadd.xlane.f32.xlu1 %v794_v16 }
 0x2f4   : > { %722 = vperm.xlu0 %2932, %v704_v17  }
 0x2f8   : > { %732 = vperm.xlu0 %2932, %v706_v18  }
 0x2fc   : > { %737 = vperm.xlu0 %2932, %v707_v19  }
 0x300   : > { %742 = vperm.xlu0 %2932, %v708_v20  }
 0x304   : > { %747 = vperm.xlu0 %2932, %v709_v21  }
 0x30f   : > { %947 = vxpose.xlu1.c.b16.start.end [1/1] (short) (narrow) %v2934_v22, 64 }
 0x313   : > { %2933 = vset.pattern.permute.xlu1 %v3621_v0 }
 0x31f   : > { %727 = vperm.xlu1 %2933, %v705_v23  }
 0x36b   : > { %v802_v24 = vpop.xlane.xlu0 %801 }
 0x36c   : > { %v817_v25 = vmul.f32 0.0078125, %v802_v24 }
 0x36e   : > { %v825_v26 = vadd.f32 1e-05, %v817_v25 }
 0x36f   : > { %v804_v27 = vpop.xlane.xlu1 %803 }
 0x370   : > { %2979 = vrsqrt.f32 %v825_v26  ;;  %v818_v28 = vmul.f32 0.0078125, %v804_v27 }
 0x372   : > { %v826_v30 = vadd.f32 1e-05, %v818_v28 }
 0x373   : > { %v723_v31 = vpop.permute.xlu0 %722 }
 0x374   : > { %2981 = vrsqrt.f32 %v826_v30  ;;  %v4198_v32 = vmul.f32 %v723_v31, %v696_v29  ;;  %v898_v30 = vld [vmem:[#allocation11 + $0x38] sm:$0xff] }
 0x375   : > { %v4200_v33 = vpop.trf.xlu1 }
 0x376   : > { %764 = vadd.xlane.f32.xlu1 %v4198_v32  ;;  %2665 = vmatprep.mubr.msk.bf16.mxu0 %vm963_vm0, %v4200_v33 }
 0x377   : > { %v733_v34 = vpop.permute.xlu0 %732  ;;  %2687 = vmatprep.mubr.msk.bf16.mxu1 %vm963_vm0, %v4200_v33 }
 0x378   : > { %v4240_v63 = vmul.f32 %v733_v34, %v698_v62 }
 0x379   : > { %v4222_v52 = vpop.trf.xlu1 }
 0x37a   : > { %v2980_v36 = vpop.eup %2979 }
 0x37b   : > { %v738_v37 = vpop.permute.xlu0 %737  ;;  %v841_v38 = vmul.f32 %v2980_v36, %v785_v11 }
 0x37c   : > { %v4208_v39 = vmul.f32 %v738_v37, %v699_v35 }
 0x37d   : > { %v855_v44 = vmul.f32 %v4210_v40, %v841_v38  ;;  %v4225_v54 = vpop.trf.xlu1 }
 0x37e   : > { %v2982_v41 = vpop.eup %2981  ;;  %770 = vadd.xlane.f32.xlu1 %v4208_v39 }
 0x37f   : > { %v743_v42 = vpop.permute.xlu0 %742  ;;  %v842_v43 = vmul.f32 %v2982_v41, %v786_v15  ;;  %v869_v49 = vadd.f32 %v4214_v45, %v855_v44 }
 0x380   : > { %v4244_v2 = vmul.f32 %v743_v42, %v700_v1 }
 0x381   : > { %v856_v47 = vmul.f32 %v4210_v40, %v842_v43  ;;  %v4231_v55 = vpop.trf.xlu1 }
 0x383   : > { %v748_v48 = vpop.permute.xlu0 %747  ;;  %v870_v50 = vadd.f32 %v4214_v45, %v856_v47 }
 0x384   : > { %v4220_v51 = vmul.f32 %v748_v48, %v701_v46 }
 0x385   : > { %v877_v53 = vpack.c.bf16 %v870_v50, %v869_v49 }
 0x386   : > { %774 = vadd.xlane.f32.xlu1 %v4220_v51 }
 0x387   : > { %2663 = vmatprep.subr.bf16.mxu0 %v877_v53 }
 0x388   : > { %2664 = vmatpush3.bf16.msra.mxu0 %v877_v53 }
 0x389   : > { %2673 = vmatprep.subr.bf16.mxu0 %v3622_v7 }
 0x38b   : > { %2666 = vmatmul.mubr.msk.bf16.vlgmr.msra.gmra.mrb[0].mxu0 %vm963_vm0, %v4222_v52 }
 0x38c   : > { %2669 = vmatprep.mubr.msk.bf16.mxu0 %vm963_vm0, %v4225_v54 }
 0x393   : > { %2670 = vmatmul.mubr.msk.bf16.gmra.mrb[4].mxu0 %vm963_vm0, %v4231_v55 }
 0x394   : > { %2681 = vmatprep.mubr.msk.bf16.mxu0 %vm3623_vm1, %v3622_v7 }
 0x397   : > { %908 = vperm.xlu1 %2933, %v892_v56  }
 0x39b   : > { %913 = vperm.xlu1 %2933, %v893_v57  }
 0x39e   : > { %v728_v60 = vpop.permute.xlu1 %727 }
 0x39f   : > { %v4236_v61 = vmul.f32 %v728_v60, %v697_v58  ;;  %923 = vperm.xlu1 %2933, %v895_v59  }
 0x3a1   : > { %766 = vadd.xlane.f32.xlu0 %v4236_v61 }
 0x3a5   : > { %768 = vadd.xlane.f32.xlu0 %v4240_v63 }
 0x3a9   : > { %772 = vadd.xlane.f32.xlu0 %v4244_v2 }
 0x3bf   : > { %903 = vperm.xlu0 %2932, %v891_v3  }
 0x3c3   : > { %918 = vperm.xlu0 %2932, %v894_v4  }
 0x3c7   : > { %928 = vperm.xlu0 %2932, %v896_v6  }
 0x403   : > { %v765_v9 = vpop.xlane.xlu1 %764 }
 0x404   : > { %v779_v10 = vmul.f32 0.0078125, %v765_v9 }
 0x406   : > { %v4249_v11 = vsub.f32 %v4198_v32, %v779_v10 }
 0x408   : > { %v795_v12 = vmul.f32 %v4249_v11, %v4249_v11 }
 0x40a   : > { %805 = vadd.xlane.f32.xlu0 %v795_v12 }
 0x40b   : > { %v771_v17 = vpop.xlane.xlu1 %770 }
 0x40c   : > { %v782_v21 = vmul.f32 0.0078125, %v771_v17 }
 0x40e   : > { %v4264_v25 = vsub.f32 %v4208_v39, %v782_v21 }
 0x410   : > { %v798_v28 = vmul.f32 %v4264_v25, %v4264_v25 }
 0x413   : > { %v775_v23 = vpop.xlane.xlu1 %774 }
 0x414   : > { %v784_v26 = vmul.f32 0.0078125, %v775_v23 }
 0x416   : > { %v4267_v27 = vsub.f32 %v4220_v51, %v784_v26 }
 0x417   : > { %v4273_v34 = vpop.permute.xlu1 %908 }
 0x418   : > { %v800_v29 = vmul.f32 %v4267_v27, %v4267_v27 }
 0x41b   : > { %v4277_v36 = vpop.permute.xlu1 %913 }
 0x41f   : > { %v4289_v59 = vpop.permute.xlu1 %923 }
 0x420   : > { %933 = vperm.xlu0 %2932, %v897_v13  }
 0x42e   : > { %v767_v14 = vpop.xlane.xlu0 %766 }
 0x42f   : > { %v780_v15 = vmul.f32 0.0078125, %v767_v14  ;;  %v2935_v14 = vld [vmem:[#allocation13] sm:$0xff]  }
 0x431   : > { %v4254_v16 = vsub.f32 %v4236_v61, %v780_v15 }
 0x432   : > { %v769_v18 = vpop.xlane.xlu0 %768 }
 0x433   : > { %v781_v19 = vmul.f32 0.0078125, %v769_v18  ;;  %v796_v20 = vmul.f32 %v4254_v16, %v4254_v16 }
 0x435   : > { %v4259_v22 = vsub.f32 %v4240_v63, %v781_v19  ;;  %807 = vadd.xlane.f32.xlu1 %v796_v20 }
 0x436   : > { %v773_v31 = vpop.xlane.xlu0 %772 }
 0x437   : > { %v797_v24 = vmul.f32 %v4259_v22, %v4259_v22  ;;  %v783_v56 = vmul.f32 0.0078125, %v773_v31 }
 0x439   : > { %809 = vadd.xlane.f32.xlu1 %v797_v24  ;;  %v4292_v62 = vsub.f32 %v4244_v2, %v783_v56 }
 0x43b   : > { %v799_v13 = vmul.f32 %v4292_v62, %v4292_v62 }
 0x43e   : > { %v4275_v35 = vpop.permute.xlu0 %903 }
 0x43f   : > { %811 = vadd.xlane.f32.xlu0 %v798_v28  ;;  %v2936_v28 = vld [vmem:[#allocation13 + $0x8] sm:$0xff]  }
 0x442   : > { %v4280_v42 = vpop.permute.xlu0 %918 }
 0x443   : > { %815 = vadd.xlane.f32.xlu0 %v800_v29 }
 0x446   : > { %v4297_v4 = vpop.permute.xlu0 %928 }
 0x44a   : > { %938 = vperm.xlu1 %2933, %v898_v30  }
 0x45e   : > { %v2667_v37 = vpop.f32.mrb[0].mxu0 }
 0x45f   : > { %v1019_v38 = vadd.f32 %v2667_v37, %v4277_v36  ;;  %v1010_v41 = vpop.f32.mrb[1].mxu0 }
 0x460   : > { %v1011_v43 = vadd.f32 %v1010_v41, %v4275_v35  ;;  %v2668_v44 = vpop.f32.mrb[2].mxu0 }
 0x461   : > { %v1051_v46 = vmul.f32 0.70710677, %v1019_v38  ;;  %v1022_v47 = vadd.f32 %v2668_v44, %v4280_v42  ;;  %v1013_v48 = vpop.f32.mrb[3].mxu0  ;;  %v1043_v23 = vmul.f32 0.5, %v1019_v38  ;;  %v2938_v38 = vld [vmem:[#allocation13 + $0x18] sm:$0xff]  }
 0x462   : > { %v1049_v49 = vmul.f32 0.70710677, %v1011_v43  ;;  %v1014_v50 = vadd.f32 %v1013_v48, %v4273_v34  ;;  %v1041_v29 = vmul.f32 0.5, %v1011_v43 }
 0x463   : > { %2983 = verf.f32 %v1051_v46  ;;  %v1052_v53 = vmul.f32 0.70710677, %v1022_v47  ;;  %v1044_v24 = vmul.f32 0.5, %v1022_v47 }
 0x464   : > { %2985 = verf.f32 %v1049_v49  ;;  %v1050_v57 = vmul.f32 0.70710677, %v1014_v50  ;;  %v1042_v30 = vmul.f32 0.5, %v1014_v50  ;;  %v2937_v49 = vld [vmem:[#allocation13 + $0x10] sm:$0xff]  }
 0x465   : > { %2987 = verf.f32 %v1052_v53 }
 0x466   : > { %2989 = verf.f32 %v1050_v57  ;;  %v4287_v58 = vpop.f32.mrb[4].mxu0 }
 0x467   : > { %v1026_v60 = vpop.f32.mrb[5].mxu0 }
 0x468   : > { %v1027_v1 = vadd.f32 %v1026_v60, %v4289_v59  ;;  %v4295_v3 = vpop.f32.mrb[6].mxu0 }
 0x469   : > { %v1029_v6 = vpop.f32.mrb[7].mxu0 }
 0x46a   : > { %v1053_v9 = vmul.f32 0.70710677, %v1027_v1  ;;  %v1030_v10 = vadd.f32 %v1029_v6, %v4297_v4  ;;  %v1045_v47 = vmul.f32 0.5, %v1027_v1 }
 0x46c   : > { %2991 = verf.f32 %v1053_v9  ;;  %v1054_v12 = vmul.f32 0.70710677, %v1030_v10  ;;  %v1046_v43 = vmul.f32 0.5, %v1030_v10 }
 0x46d   : > { %v2984_v15 = vpop.eup %2983 }
 0x46e   : > { %v2986_v17 = vpop.eup %2985  ;;  %v1067_v18 = vadd.f32 1.0, %v2984_v15  ;;  %2993 = verf.f32 %v1054_v12  ;;  %813 = vadd.xlane.f32.xlu1 %v799_v13  ;;  %v899_v12 = vld [vmem:[#allocation14] sm:$0xff] }
 0x46f   : > { %v2988_v19 = vpop.eup %2987  ;;  %v1065_v20 = vadd.f32 1.0, %v2986_v17 }
 0x470   : > { %v2990_v21 = vpop.eup %2989  ;;  %v1068_v26 = vadd.f32 1.0, %v2988_v19  ;;  %1119 = vxpose.xlu0.c.b16.start [1/4] (short) (narrow) %v2935_v14, 16  ;;  %v1075_v37 = vmul.f32 %v1067_v18, %v1043_v23  ;;  %v900_v14 = vld [vmem:[#allocation14 + $0x8] sm:$0xff] }
 0x471   : > { %v1066_v31 = vadd.f32 1.0, %v2990_v21  ;;  %v1073_v44 = vmul.f32 %v1065_v20, %v1041_v29 }
 0x472   : > { %v1076_v41 = vmul.f32 %v1068_v26, %v1044_v24 }
 0x473   : > { %v1074_v46 = vmul.f32 %v1066_v31, %v1042_v30 }
 0x474   : > { %v1082_v48 = vpack.c.bf16 %v1076_v41, %v1075_v37  ;;  %1120 = vxpose.xlu0.c.b16.cont [2/4] (short) (narrow) %v2936_v28, 16 }
 0x475   : > { %v1081_v53 = vpack.c.bf16 %v1074_v46, %v1073_v44 }
 0x476   : > { %v2992_v56 = vpop.eup %2991 }
 0x477   : > { %v1069_v57 = vadd.f32 1.0, %v2992_v56  ;;  %2674 = vmatpush3.bf16.msra.mxu0 %v1081_v53 }
 0x478   : > { %v2994_v60 = vpop.eup %2993  ;;  %2675 = vmatprep.subr.bf16.mxu0 %v3622_v7  ;;  %1121 = vxpose.xlu0.c.b16.cont [3/4] (short) (narrow) %v2937_v49, 16 }
 0x479   : > { %v1070_v50 = vadd.f32 1.0, %v2994_v60  ;;  %v1077_v6 = vmul.f32 %v1069_v57, %v1045_v47 }
 0x47b   : > { %v1078_v9 = vmul.f32 %v1070_v50, %v1046_v43  ;;  %2676 = vmatpush3.bf16.msra.mxu0 %v1082_v48 }
 0x47c   : > { %2677 = vmatprep.subr.bf16.mxu0 %v3622_v7  ;;  %1122 = vxpose.xlu0.c.b16.end [4/4] (short) (narrow) %v2938_v38, 16 }
 0x47d   : > { %v1083_v13 = vpack.c.bf16 %v1078_v9, %v1077_v6 }
 0x47f   : > { %1087 = vperm.xlu1 %2933, %v899_v12   ;;  %2678 = vmatpush3.bf16.msra.mxu0 %v1083_v13 }
 0x480   : > { %2679 = vmatprep.subr.bf16.mxu0 %v3622_v7 }
 0x483   : > { %1092 = vperm.xlu1 %2933, %v900_v14  }
 0x497   : > { %v806_v15 = vpop.xlane.xlu0 %805 }
 0x498   : > { %v819_v17 = vmul.f32 0.0078125, %v806_v15 }
 0x49a   : > { %v827_v18 = vadd.f32 1e-05, %v819_v17 }
 0x49c   : > { %2995 = vrsqrt.f32 %v827_v18 }
 0x49f   : > { %v4305_v1 = vpop.permute.xlu0 %933 }
 0x4a0   : > { %v1035_v10 = vadd.f32 %v4287_v58, %v4305_v1 }
 0x4a2   : > { %v1055_v23 = vmul.f32 0.70710677, %v1035_v10  ;;  %v1047_v6 = vmul.f32 0.5, %v1035_v10 }
 0x4a6   : > { %v2996_v30 = vpop.eup %2995 }
 0x4a7   : > { %v843_v58 = vmul.f32 %v2996_v30, %v4249_v11 }
 0x4a9   : > { %v857_v53 = vmul.f32 %v4210_v40, %v843_v58 }
 0x4ab   : > { %v871_v38 = vadd.f32 %v4214_v45, %v857_v53 }
 0x4c2   : > { %v808_v19 = vpop.xlane.xlu1 %807 }
 0x4c3   : > { %v820_v20 = vmul.f32 0.0078125, %v808_v19 }
 0x4c5   : > { %v828_v21 = vadd.f32 1e-05, %v820_v20 }
 0x4c6   : > { %v810_v24 = vpop.xlane.xlu1 %809 }
 0x4c7   : > { %2997 = vrsqrt.f32 %v828_v21  ;;  %v821_v26 = vmul.f32 0.0078125, %v810_v24 }
 0x4c8   : > { %2999 = verf.f32 %v1055_v23 }
 0x4c9   : > { %v829_v28 = vadd.f32 1e-05, %v821_v26 }
 0x4ca   : > { %v4309_v29 = vpop.permute.xlu1 %938 }
 0x4cb   : > { %3001 = vrsqrt.f32 %v829_v28  ;;  %v1038_v31 = vadd.f32 %v4295_v3, %v4309_v29 }
 0x4cc   : > { %v812_v37 = vpop.xlane.xlu0 %811 }
 0x4cd   : > { %v1056_v41 = vmul.f32 0.70710677, %v1038_v31  ;;  %v822_v44 = vmul.f32 0.0078125, %v812_v37  ;;  %v1048_v9 = vmul.f32 0.5, %v1038_v31 }
 0x4cf   : > { %3003 = verf.f32 %v1056_v41  ;;  %v830_v46 = vadd.f32 1e-05, %v822_v44 }
 0x4d0   : > { %v816_v13 = vpop.xlane.xlu0 %815 }
 0x4d1   : > { %v2998_v48 = vpop.eup %2997  ;;  %3005 = vrsqrt.f32 %v830_v46  ;;  %v824_v23 = vmul.f32 0.0078125, %v816_v13 }
 0x4d2   : > { %v844_v49 = vmul.f32 %v2998_v48, %v4254_v16  ;;  %v3000_v56 = vpop.eup %2999 }
 0x4d3   : > { %v1071_v47 = vadd.f32 1.0, %v3000_v56  ;;  %v832_v24 = vadd.f32 1e-05, %v824_v23 }
 0x4d4   : > { %v858_v57 = vmul.f32 %v4210_v40, %v844_v49 }
 0x4d5   : > { %v3002_v60 = vpop.eup %3001  ;;  %v1079_v14 = vmul.f32 %v1071_v47, %v1047_v6  ;;  %3007 = vrsqrt.f32 %v832_v24 }
 0x4d6   : > { %v872_v3 = vadd.f32 %v4214_v45, %v858_v57  ;;  %v845_v11 = vmul.f32 %v3002_v60, %v4259_v22  ;;  %v4328_v19 = vpop.trf.xlu0 }
 0x4d8   : > { %v878_v43 = vpack.c.bf16 %v872_v3, %v871_v38  ;;  %v859_v18 = vmul.f32 %v4210_v40, %v845_v11 }
 0x4d9   : > { %v3004_v50 = vpop.eup %3003 }
 0x4da   : > { %v1072_v12 = vadd.f32 1.0, %v3004_v50  ;;  %2685 = vmatprep.subr.bf16.mxu1 %v878_v43  ;;  %v873_v20 = vadd.f32 %v4214_v45, %v859_v18 }
 0x4db   : > { %v3006_v16 = vpop.eup %3005  ;;  %2686 = vmatpush3.bf16.msra.mxu1 %v878_v43 }
 0x4dc   : > { %v1080_v15 = vmul.f32 %v1072_v12, %v1048_v9  ;;  %v846_v17 = vmul.f32 %v3006_v16, %v4264_v25  ;;  %2695 = vmatprep.subr.bf16.mxu1 %v3622_v7 }
 0x4de   : > { %2688 = vmatmul.mubr.msk.bf16.vlgmr.msra.gmra.mrb[0].mxu1 %vm963_vm0, %v4222_v52  ;;  %v1084_v22 = vpack.c.bf16 %v1080_v15, %v1079_v14  ;;  %v860_v10 = vmul.f32 %v4210_v40, %v846_v17 }
 0x4df   : > { %2691 = vmatprep.mubr.msk.bf16.mxu1 %vm963_vm0, %v4225_v54  ;;  %v3008_v31 = vpop.eup %3007 }
 0x4e0   : > { %2680 = vmatpush3.bf16.msra.mxu0 %v1084_v22  ;;  %v874_v25 = vadd.f32 %v4214_v45, %v860_v10  ;;  %v848_v37 = vmul.f32 %v3008_v31, %v4267_v27 }
 0x4e2   : > { %v879_v21 = vpack.c.bf16 %v874_v25, %v873_v20  ;;  %v862_v58 = vmul.f32 %v4210_v40, %v848_v37 }
 0x4e3   : > { %2682 = vmatmul.mubr.msk.bf16.vlgmr.msra.gmra.mrb[8].mxu0 %vm1135_vm2, %v4328_v19 }
 0x4e4   : > { %2707 = vmatprep.subr.bf16.mxu0 %v879_v21  ;;  %2709 = vmatprep.mubr.msk.bf16.mxu0 %vm963_vm0, %v4200_v33 }
 0x4e5   : > { %2708 = vmatpush3.bf16.msra.mxu0 %v879_v21 }
 0x4e6   : > { %2692 = vmatmul.mubr.msk.bf16.gmra.mrb[4].mxu1 %vm963_vm0, %v4231_v55 }
 0x4e7   : > { %2703 = vmatprep.mubr.msk.bf16.mxu1 %vm3623_vm1, %v3622_v7 }
 0x4eb   : > { %2710 = vmatmul.mubr.msk.bf16.vlgmr.msra.gmra.mrb[12].mxu0 %vm963_vm0, %v4222_v52 }
 0x4ec   : > { %2713 = vmatprep.mubr.msk.bf16.mxu0 %vm963_vm0, %v4225_v54 }
 0x4f3   : > { %2714 = vmatmul.mubr.msk.bf16.gmra.mrb[16].mxu0 %vm963_vm0, %v4231_v55 }
 0x4f4   : > { %2731 = vmatprep.mubr.msk.bf16.mxu0 %vm963_vm0, %v4200_v33  ;;  %v876_v33 = vadd.f32 %v4214_v45, %v862_v58 }
 0x4fb   : > { %v814_v26 = vpop.xlane.xlu1 %813 }
 0x4fc   : > { %v823_v28 = vmul.f32 0.0078125, %v814_v26 }
 0x4fe   : > { %v831_v30 = vadd.f32 1e-05, %v823_v28 }
 0x500   : > { %3009 = vrsqrt.f32 %v831_v30 }
 0x50a   : > { %v3010_v41 = vpop.eup %3009 }
 0x50b   : > { %v847_v44 = vmul.f32 %v3010_v41, %v4292_v62 }
 0x50d   : > { %v861_v46 = vmul.f32 %v4210_v40, %v847_v44  ;;  %v4361_v40 = vpop.permute.xlu1 %1087 }
 0x50f   : > { %v875_v48 = vadd.f32 %v4214_v45, %v861_v46 }
 0x511   : > { %v880_v49 = vpack.c.bf16 %v876_v33, %v875_v48  ;;  %v4368_v50 = vpop.permute.xlu1 %1092 }
 0x513   : > { %2729 = vmatprep.subr.bf16.mxu0 %v880_v49 }
 0x514   : > { %2730 = vmatpush3.bf16.msra.mxu0 %v880_v49 }
 0x517   : > { %2732 = vmatmul.mubr.msk.bf16.vlgmr.msra.gmra.mrb[20].mxu0 %vm963_vm0, %v4222_v52 }
 0x518   : > { %2735 = vmatprep.mubr.msk.bf16.mxu0 %vm963_vm0, %v4225_v54 }
 0x51f   : > { %2736 = vmatmul.mubr.msk.bf16.gmra.mrb[24].mxu0 %vm963_vm0, %v4231_v55 }
 0x520   : > { %1900 = vmatprep.mubr.bf16.mxu0 %v3621_v0 }
 0x5b1   : > { %v2689_v27 = vpop.f32.mrb[0].mxu1 }
 0x5b2   : > { %v1223_v62 = vadd.f32 %v2689_v27, %v4277_v36  ;;  %v1214_v45 = vpop.f32.mrb[1].mxu1 }
 0x5b3   : > { %v1215_v53 = vadd.f32 %v1214_v45, %v4275_v35  ;;  %v2690_v56 = vpop.f32.mrb[2].mxu1 }
 0x5b4   : > { %v1255_v57 = vmul.f32 0.70710677, %v1223_v62  ;;  %v1226_v52 = vadd.f32 %v2690_v56, %v4280_v42  ;;  %v1217_v60 = vpop.f32.mrb[3].mxu1  ;;  %v1247_v33 = vmul.f32 0.5, %v1223_v62 }
 0x5b5   : > { %v1253_v38 = vmul.f32 0.70710677, %v1215_v53  ;;  %v1218_v54 = vadd.f32 %v1217_v60, %v4273_v34 }
 0x5b6   : > { %3011 = verf.f32 %v1255_v57  ;;  %v1256_v55 = vmul.f32 0.70710677, %v1226_v52  ;;  %v1173_v3 = vpop.f32.mrb[8].mxu0  ;;  %v1248_v57 = vmul.f32 0.5, %v1226_v52 }
 0x5b7   : > { %3013 = verf.f32 %v1253_v38  ;;  %v1254_v47 = vmul.f32 0.70710677, %v1218_v54  ;;  %v1174_v43 = vadd.f32 %v1173_v3, %v4361_v40  ;;  %v2683_v11 = vpop.f32.mrb[9].mxu0  ;;  %v1246_v3 = vmul.f32 0.5, %v1218_v54 }
 0x5b8   : > { %3015 = verf.f32 %v1256_v55  ;;  %v1176_v6 = vpop.f32.mrb[10].mxu0  ;;  %v1245_v55 = vmul.f32 0.5, %v1215_v53 }
 0x5b9   : > { %3017 = verf.f32 %v1254_v47  ;;  %v4371_v9 = vadd.f32 %v1174_v43, %v4181_v5  ;;  %v1177_v12 = vadd.f32 %v1176_v6, %v4368_v50  ;;  %v2693_v16 = vpop.f32.mrb[4].mxu1  ;;  %v2684_v13 = vpop.f32.mrb[11].mxu0 }
 0x5ba   : > { %v4375_v14 = vadd.f32 %v2693_v16, %v4305_v1  ;;  %v1230_v15 = vpop.f32.mrb[5].mxu1 }
 0x5bb   : > { %v4378_v17 = vadd.f32 %v1177_v12, %v4185_v8  ;;  %v4381_v18 = vadd.f32 %v1230_v15, %v4289_v59  ;;  %v2694_v22 = vpop.f32.mrb[6].mxu1  ;;  %1640 = vadd.xlane.f32.xlu1 %v4371_v9 }
 0x5bc   : > { %v1259_v5 = vmul.f32 0.70710677, %v4375_v14  ;;  %v4386_v10 = vadd.f32 %v2694_v22, %v4309_v29  ;;  %v1233_v20 = vpop.f32.mrb[7].mxu1 }
 0x5bd   : > { %v1257_v25 = vmul.f32 0.70710677, %v4381_v18  ;;  %v4390_v21 = vadd.f32 %v1233_v20, %v4297_v4  ;;  %1642 = vadd.xlane.f32.xlu0 %v4378_v17 }
 0x5be   : > { %3019 = verf.f32 %v1259_v5  ;;  %v1260_v8 = vmul.f32 0.70710677, %v4386_v10  ;;  %v2711_v23 = vpop.f32.mrb[12].mxu0 }
 0x5bf   : > { %3021 = verf.f32 %v1257_v25  ;;  %v1258_v24 = vmul.f32 0.70710677, %v4390_v21  ;;  %v4396_v26 = vadd.f32 %v2711_v23, %v4277_v36  ;;  %v1364_v28 = vpop.f32.mrb[13].mxu0 }
 0x5c0   : > { %v3012_v30 = vpop.eup %3011  ;;  %3023 = verf.f32 %v1260_v8  ;;  %v4399_v31 = vadd.f32 %v1364_v28, %v4275_v35  ;;  %v2712_v37 = vpop.f32.mrb[14].mxu0 }
 0x5c1   : > { %v3014_v41 = vpop.eup %3013  ;;  %v1271_v44 = vadd.f32 1.0, %v3012_v30  ;;  %3025 = verf.f32 %v1258_v24  ;;  %v1405_v58 = vmul.f32 0.70710677, %v4396_v26  ;;  %v1367_v46 = vpop.f32.mrb[15].mxu0  ;;  %v4404_v45 = vadd.f32 %v2712_v37, %v4280_v42 }
 0x5c2   : > { %v3016_v48 = vpop.eup %3015  ;;  %v1269_v49 = vadd.f32 1.0, %v3014_v41  ;;  %v1403_v27 = vmul.f32 0.70710677, %v4399_v31  ;;  %v4407_v38 = vadd.f32 %v1367_v46, %v4273_v34  ;;  %v1251_v37 = vmul.f32 0.5, %v4375_v14 }
 0x5c3   : > { %v3018_v56 = vpop.eup %3017  ;;  %v1272_v60 = vadd.f32 1.0, %v3016_v48  ;;  %3027 = verf.f32 %v1405_v58  ;;  %v1279_v43 = vmul.f32 %v1271_v44, %v1247_v33  ;;  %v1406_v62 = vmul.f32 0.70710677, %v4404_v45 }
 0x5c4   : > { %v1270_v47 = vadd.f32 1.0, %v3018_v56  ;;  %3029 = verf.f32 %v1403_v27  ;;  %v1404_v6 = vmul.f32 0.70710677, %v4407_v38  ;;  %v1277_v12 = vmul.f32 %v1269_v49, %v1245_v55 }
 0x5c5   : > { %v1280_v11 = vmul.f32 %v1272_v60, %v1248_v57  ;;  %3031 = verf.f32 %v1406_v62  ;;  %v1249_v48 = vmul.f32 0.5, %v4381_v18  ;;  %v1252_v33 = vmul.f32 0.5, %v4386_v10 }
 0x5c6   : > { %v1278_v16 = vmul.f32 %v1270_v47, %v1246_v3  ;;  %v2715_v13 = vpop.f32.mrb[16].mxu0  ;;  %3033 = verf.f32 %v1404_v6  ;;  %v1250_v27 = vmul.f32 0.5, %v4390_v21 }
 0x5c7   : > { %v1286_v15 = vpack.c.bf16 %v1280_v11, %v1279_v43  ;;  %v4412_v52 = vadd.f32 %v2715_v13, %v4305_v1  ;;  %v1380_v22 = vpop.f32.mrb[17].mxu0  ;;  %v1398_v13 = vmul.f32 0.5, %v4404_v45 }
 0x5c8   : > { %v3020_v5 = vpop.eup %3019  ;;  %v1285_v53 = vpack.c.bf16 %v1278_v16, %v1277_v12  ;;  %v4415_v54 = vadd.f32 %v1380_v22, %v4289_v59  ;;  %v2716_v20 = vpop.f32.mrb[18].mxu0  ;;  %v1397_v16 = vmul.f32 0.5, %v4396_v26 }
 0x5c9   : > { %v3022_v25 = vpop.eup %3021  ;;  %v1275_v8 = vadd.f32 1.0, %v3020_v5  ;;  %v1409_v23 = vmul.f32 0.70710677, %v4412_v52  ;;  %v1392_v24 = vadd.f32 %v2716_v20, %v4309_v29  ;;  %v1383_v28 = vpop.f32.mrb[19].mxu0  ;;  %v1395_v5 = vmul.f32 0.5, %v4399_v31 }
 0x5ca   : > { %v3024_v30 = vpop.eup %3023  ;;  %v1273_v41 = vadd.f32 1.0, %v3022_v25  ;;  %v1407_v44 = vmul.f32 0.70710677, %v4415_v54  ;;  %v1384_v58 = vadd.f32 %v1383_v28, %v4297_v4  ;;  %2696 = vmatpush3.bf16.msra.mxu1 %v1285_v53  ;;  %v1396_v53 = vmul.f32 0.5, %v4407_v38 }
 0x5cb   : > { %v3026_v46 = vpop.eup %3025  ;;  %v1276_v49 = vadd.f32 1.0, %v3024_v30  ;;  %3035 = verf.f32 %v1409_v23  ;;  %2697 = vmatprep.subr.bf16.mxu1 %v3622_v7  ;;  %v1410_v14 = vmul.f32 0.70710677, %v1392_v24  ;;  %v1283_v60 = vmul.f32 %v1275_v8, %v1251_v37 }
 0x5cc   : > { %v1274_v56 = vadd.f32 1.0, %v3026_v46  ;;  %3037 = verf.f32 %v1407_v44  ;;  %v1408_v3 = vmul.f32 0.70710677, %v1384_v58  ;;  %v1281_v43 = vmul.f32 %v1273_v41, %v1249_v48 }
 0x5cd   : > { %v3028_v57 = vpop.eup %3027  ;;  %v1284_v55 = vmul.f32 %v1276_v49, %v1252_v33  ;;  %3039 = verf.f32 %v1410_v14  ;;  %v1401_v38 = vmul.f32 0.5, %v4412_v52  ;;  %v1402_v46 = vmul.f32 0.5, %v1392_v24 }
 0x5ce   : > { %v3030_v47 = vpop.eup %3029  ;;  %v1282_v11 = vmul.f32 %v1274_v56, %v1250_v27  ;;  %2698 = vmatpush3.bf16.msra.mxu1 %v1286_v15  ;;  %3041 = verf.f32 %v1408_v3  ;;  %v1421_v62 = vadd.f32 1.0, %v3028_v57  ;;  %v1399_v33 = vmul.f32 0.5, %v4415_v54 }
 0x5cf   : > { %v1288_v18 = vpack.c.bf16 %v1284_v55, %v1283_v60  ;;  %2699 = vmatprep.subr.bf16.mxu1 %v3622_v7  ;;  %v3032_v6 = vpop.eup %3031  ;;  %v1419_v21 = vadd.f32 1.0, %v3030_v47  ;;  %v1400_v49 = vmul.f32 0.5, %v1384_v58 }
 0x5d0   : > { %v1287_v10 = vpack.c.bf16 %v1282_v11, %v1281_v43  ;;  %v3034_v12 = vpop.eup %3033  ;;  %v1422_v22 = vadd.f32 1.0, %v3032_v6  ;;  %v1429_v20 = vmul.f32 %v1421_v62, %v1397_v16 }
 0x5d1   : > { %v1420_v15 = vadd.f32 1.0, %v3034_v12  ;;  %v1427_v23 = vmul.f32 %v1419_v21, %v1395_v5 }
 0x5d2   : > { %2700 = vmatpush3.bf16.msra.mxu1 %v1287_v10  ;;  %v1430_v25 = vmul.f32 %v1422_v22, %v1398_v13 }
 0x5d3   : > { %2701 = vmatprep.subr.bf16.mxu1 %v3622_v7  ;;  %v1428_v28 = vmul.f32 %v1420_v15, %v1396_v53 }
 0x5d4   : > { %v1436_v37 = vpack.c.bf16 %v1430_v25, %v1429_v20 }
 0x5d5   : > { %v3036_v8 = vpop.eup %3035  ;;  %v1435_v26 = vpack.c.bf16 %v1428_v28, %v1427_v23 }
 0x5d6   : > { %v3038_v30 = vpop.eup %3037  ;;  %2702 = vmatpush3.bf16.msra.mxu1 %v1288_v18  ;;  %v1425_v41 = vadd.f32 1.0, %v3036_v8 }
 0x5d7   : > { %2717 = vmatprep.subr.bf16.mxu1 %v3622_v7  ;;  %v3040_v45 = vpop.eup %3039  ;;  %v1423_v44 = vadd.f32 1.0, %v3038_v30 }
 0x5d8   : > { %v3042_v31 = vpop.eup %3041  ;;  %v1426_v48 = vadd.f32 1.0, %v3040_v45  ;;  %v1433_v56 = vmul.f32 %v1425_v41, %v1401_v38 }
 0x5d9   : > { %2704 = vmatmul.mubr.msk.bf16.vlgmr.msra.gmra.mrb[8].mxu1 %vm1135_vm2, %v4328_v19  ;;  %v1424_v27 = vadd.f32 1.0, %v3042_v31  ;;  %v1431_v57 = vmul.f32 %v1423_v44, %v1399_v33 }
 0x5da   : > { %2718 = vmatpush3.bf16.msra.mxu1 %v1435_v26  ;;  %2725 = vmatprep.mubr.msk.bf16.mxu1 %vm3623_vm1, %v3622_v7  ;;  %v1434_v14 = vmul.f32 %v1426_v48, %v1402_v46 }
 0x5db   : > { %2719 = vmatprep.subr.bf16.mxu1 %v3622_v7  ;;  %v1432_v60 = vmul.f32 %v1424_v27, %v1400_v49 }
 0x5dc   : > { %v1438_v52 = vpack.c.bf16 %v1434_v14, %v1433_v56 }
 0x5dd   : > { %v1437_v24 = vpack.c.bf16 %v1432_v60, %v1431_v57 }
 0x5de   : > { %2720 = vmatpush3.bf16.msra.mxu1 %v1436_v37 }
 0x5df   : > { %2721 = vmatprep.subr.bf16.mxu1 %v3622_v7 }
 0x5e2   : > { %2722 = vmatpush3.bf16.msra.mxu1 %v1437_v24 }
 0x5e3   : > { %2723 = vmatprep.subr.bf16.mxu1 %v3622_v7 }
 0x5e6   : > { %2724 = vmatpush3.bf16.msra.mxu1 %v1438_v52 }
 0x5e7   : > { %2739 = vmatprep.subr.bf16.mxu1 %v3622_v7 }
 0x5e9   : > { %2726 = vmatmul.mubr.msk.bf16.vlgmr.msra.gmra.mrb[12].mxu1 %vm1135_vm2, %v4328_v19 }
 0x5ea   : > { %v2733_v54 = vpop.f32.mrb[20].mxu0  ;;  %2747 = vmatprep.mubr.msk.bf16.mxu1 %vm3623_vm1, %v3622_v7 }
 0x5eb   : > { %v1523_v58 = vadd.f32 %v2733_v54, %v4277_v36  ;;  %v1514_v55 = vpop.f32.mrb[21].mxu0 }
 0x5ec   : > { %v1515_v3 = vadd.f32 %v1514_v55, %v4275_v35  ;;  %v2734_v47 = vpop.f32.mrb[22].mxu0 }
 0x5ed   : > { %v1555_v43 = vmul.f32 0.70710677, %v1523_v58  ;;  %v1526_v11 = vadd.f32 %v2734_v47, %v4280_v42  ;;  %v1517_v18 = vpop.f32.mrb[23].mxu0  ;;  %v1547_v30 = vmul.f32 0.5, %v1523_v58 }
 0x5ee   : > { %v1553_v10 = vmul.f32 0.70710677, %v1515_v3  ;;  %v1518_v62 = vadd.f32 %v1517_v18, %v4273_v34 }
 0x5ef   : > { %3043 = verf.f32 %v1555_v43  ;;  %v1556_v6 = vmul.f32 0.70710677, %v1526_v11  ;;  %v1548_v37 = vmul.f32 0.5, %v1526_v11 }
 0x5f0   : > { %3045 = verf.f32 %v1553_v10  ;;  %v1554_v21 = vmul.f32 0.70710677, %v1518_v62  ;;  %v1546_v41 = vmul.f32 0.5, %v1518_v62 }
 0x5f1   : > { %3047 = verf.f32 %v1556_v6 }
 0x5f2   : > { %3049 = verf.f32 %v1554_v21  ;;  %v2737_v12 = vpop.f32.mrb[24].mxu0 }
 0x5f3   : > { %v1539_v36 = vadd.f32 %v2737_v12, %v4305_v1  ;;  %v1530_v16 = vpop.f32.mrb[25].mxu0 }
 0x5f4   : > { %v1531_v35 = vadd.f32 %v1530_v16, %v4289_v59  ;;  %v2738_v13 = vpop.f32.mrb[26].mxu0 }
 0x5f5   : > { %v1559_v22 = vmul.f32 0.70710677, %v1539_v36  ;;  %v1542_v42 = vadd.f32 %v2738_v13, %v4309_v29  ;;  %v1533_v5 = vpop.f32.mrb[27].mxu0  ;;  %v1545_v29 = vmul.f32 0.5, %v1515_v3  ;;  %v1551_v60 = vmul.f32 0.5, %v1539_v36 }
 0x5f6   : > { %v1557_v53 = vmul.f32 0.70710677, %v1531_v35  ;;  %v1534_v34 = vadd.f32 %v1533_v5, %v4297_v4  ;;  %v1549_v54 = vmul.f32 0.5, %v1531_v35 }
 0x5f7   : > { %3051 = verf.f32 %v1559_v22  ;;  %v1560_v15 = vmul.f32 0.70710677, %v1542_v42  ;;  %v1552_v52 = vmul.f32 0.5, %v1542_v42 }
 0x5f8   : > { %3053 = verf.f32 %v1557_v53  ;;  %v1558_v20 = vmul.f32 0.70710677, %v1534_v34  ;;  %v1550_v58 = vmul.f32 0.5, %v1534_v34 }
 0x5f9   : > { %v3044_v25 = vpop.eup %3043  ;;  %3055 = verf.f32 %v1560_v15  ;;  %v2941_v15 = vld [vmem:[#allocation19 + $0x4] ss:$8 sps:$4 sm:$0xff]  }
 0x5fa   : > { %v3046_v8 = vpop.eup %3045  ;;  %v1571_v23 = vadd.f32 1.0, %v3044_v25  ;;  %3057 = verf.f32 %v1558_v20  ;;  %1868 = vmatprep.subr.bf16.mxu0 %v2941_v15 }
 0x5fb   : > { %v3048_v1 = vpop.eup %3047  ;;  %v1569_v28 = vadd.f32 1.0, %v3046_v8 }
 0x5fc   : > { %v3050_v59 = vpop.eup %3049  ;;  %v1572_v26 = vadd.f32 1.0, %v3048_v1  ;;  %v1579_v44 = vmul.f32 %v1571_v23, %v1547_v30 }
 0x5fd   : > { %v1570_v45 = vadd.f32 1.0, %v3050_v59  ;;  %v1577_v31 = vmul.f32 %v1569_v28, %v1545_v29 }
 0x5fe   : > { %v1580_v4 = vmul.f32 %v1572_v26, %v1548_v37 }
 0x5ff   : > { %v1578_v38 = vmul.f32 %v1570_v45, %v1546_v41  ;;  %v2942_v45 = vld [vmem:[#allocation19 + $0x10] ss:$8 sps:$4 sm:$0xff]  }
 0x600   : > { %v1586_v46 = vpack.c.bf16 %v1580_v4, %v1579_v44  ;;  %v2947_v44 = vld [vmem:[#allocation19 + $0x24] ss:$8 sps:$4 sm:$0xff]   ;;  %v2945_v4 = vld [vmem:[#allocation19 + $0x20] ss:$8 sps:$4 sm:$0xff]  }
 0x601   : > { %v3052_v48 = vpop.eup %3051  ;;  %v1585_v33 = vpack.c.bf16 %v1578_v38, %v1577_v31  ;;  %v2948_v31 = vld [vmem:[#allocation19 + $0x30] ss:$8 sps:$4 sm:$0xff]   ;;  %v2953_v38 = vld [vmem:[#allocation19 + $0x44] ss:$8 sps:$4 sm:$0xff]  }
 0x602   : > { %v3054_v49 = vpop.eup %3053  ;;  %v1575_v27 = vadd.f32 1.0, %v3052_v48  ;;  %v2956_v48 = vld [vmem:[#allocation19 + $0x54] ss:$8 sps:$4 sm:$0xff]  }
 0x603   : > { %v3056_v56 = vpop.eup %3055  ;;  %v1573_v14 = vadd.f32 1.0, %v3054_v49  ;;  %2740 = vmatpush3.bf16.msra.mxu1 %v1585_v33  ;;  %v2954_v33 = vld [vmem:[#allocation19 + $0x50] ss:$8 sps:$4 sm:$0xff]   ;;  %v2959_v49 = vld [vmem:[#allocation19 + $0x64] ss:$8 sps:$4 sm:$0xff]  }
 0x604   : > { %v3058_v57 = vpop.eup %3057  ;;  %v1576_v24 = vadd.f32 1.0, %v3056_v56  ;;  %2741 = vmatprep.subr.bf16.mxu1 %v3622_v7  ;;  %v1583_v3 = vmul.f32 %v1575_v27, %v1551_v60  ;;  %v2957_v27 = vld [vmem:[#allocation19 + $0x60] ss:$8 sps:$4 sm:$0xff]   ;;  %v2962_v56 = vld [vmem:[#allocation19 + $0x74] ss:$8 sps:$4 sm:$0xff]  }
 0x605   : > { %v1574_v55 = vadd.f32 1.0, %v3058_v57  ;;  %v1581_v43 = vmul.f32 %v1573_v14, %v1549_v54  ;;  %v2960_v14 = vld [vmem:[#allocation19 + $0x70] ss:$8 sps:$4 sm:$0xff]  }
 0x606   : > { %v1584_v47 = vmul.f32 %v1576_v24, %v1552_v52 }
 0x607   : > { %v1582_v11 = vmul.f32 %v1574_v55, %v1550_v58  ;;  %2742 = vmatpush3.bf16.msra.mxu1 %v1586_v46  ;;  %v2951_v46 = vld [vmem:[#allocation19 + $0x40] ss:$8 sps:$4 sm:$0xff]  }
 0x608   : > { %v1588_v18 = vpack.c.bf16 %v1584_v47, %v1583_v3  ;;  %2743 = vmatprep.subr.bf16.mxu1 %v3622_v7 }
 0x609   : > { %v1587_v10 = vpack.c.bf16 %v1582_v11, %v1581_v43 }
 0x60b   : > { %2744 = vmatpush3.bf16.msra.mxu1 %v1587_v10 }
 0x60c   : > { %2745 = vmatprep.subr.bf16.mxu1 %v3622_v7 }
 0x60f   : > { %2746 = vmatpush3.bf16.msra.mxu1 %v1588_v18 }
 0x612   : > { %2748 = vmatmul.mubr.msk.bf16.vlgmr.msra.gmra.mrb[16].mxu1 %vm1135_vm2, %v4328_v19 }
 0x648   : > { %v1641_v20 = vpop.xlane.xlu1 %1640 }
 0x649   : > { %v1656_v8 = vmul.f32 0.0078125, %v1641_v20 }
 0x64a   : > { %v1643_v25 = vpop.xlane.xlu0 %1642 }
 0x6ac   : > { %v1323_v62 = vpop.f32.mrb[8].mxu1 }
 0x6ad   : > { %v1324_v6 = vadd.f32 %v1323_v62, %v4361_v40  ;;  %v2705_v21 = vpop.f32.mrb[9].mxu1 }
 0x6ae   : > { %v1326_v12 = vpop.f32.mrb[10].mxu1 }
 0x6af   : > { %v4462_v36 = vadd.f32 %v1324_v6, %v4198_v32  ;;  %v1327_v16 = vadd.f32 %v1326_v12, %v4368_v50  ;;  %v2706_v35 = vpop.f32.mrb[11].mxu1 }
 0x6b1   : > { %1644 = vadd.xlane.f32.xlu1 %v4462_v36  ;;  %v4467_v13 = vadd.f32 %v1327_v16, %v4236_v61  ;;  %v2939_v61 = vld [vmem:[#allocation19] ss:$8 sps:$4 sm:$0xff]  }
 0x6b2   : > { %1869 = vmatpush1.bf16.msra.mxu0 %v2939_v61 }
 0x6b5   : > { %1646 = vadd.xlane.f32.xlu1 %v4467_v13 }
 0x6bc   : > { %v1473_v7 = vpop.f32.mrb[12].mxu1 }
 0x6bd   : > { %v1474_v19 = vadd.f32 %v1473_v7, %v4361_v40  ;;  %v2727_v22 = vpop.f32.mrb[13].mxu1 }
 0x6be   : > { %v1476_v42 = vpop.f32.mrb[14].mxu1 }
 0x6bf   : > { %v4472_v5 = vadd.f32 %v1474_v19, %v4240_v63  ;;  %v1477_v32 = vadd.f32 %v1476_v42, %v4368_v50  ;;  %v2728_v53 = vpop.f32.mrb[15].mxu1  ;;  %v1657_v63 = vmul.f32 0.0078125, %v1643_v25 }
 0x6c1   : > { %v4476_v34 = vadd.f32 %v1477_v32, %v4208_v39  ;;  %1648 = vadd.xlane.f32.xlu1 %v4472_v5  ;;  %v4482_v39 = vsub.f32 %v4371_v9, %v1656_v8  ;;  %v4489_v29 = vsub.f32 %v4378_v17, %v1657_v63  ;;  %v4530_v63 = vld [vmem:[#allocation16] ss:$0 sm:$0xff] }
 0x6c3   : > { %1650 = vadd.xlane.f32.xlu0 %v4476_v34 }
 0x6e5   : > { %v1623_v23 = vpop.f32.mrb[16].mxu1 }
 0x6e6   : > { %v1624_v1 = vadd.f32 %v1623_v23, %v4361_v40  ;;  %v2749_v28 = vpop.f32.mrb[17].mxu1  ;;  %v1672_v40 = vmul.f32 %v4482_v39, %v4482_v39 }
 0x6e7   : > { %v1626_v59 = vpop.f32.mrb[18].mxu1 }
 0x6e8   : > { %v4485_v30 = vadd.f32 %v1624_v1, %v4244_v2  ;;  %v1627_v37 = vadd.f32 %v1626_v59, %v4368_v50  ;;  %v2750_v26 = vpop.f32.mrb[19].mxu1  ;;  %v1673_v2 = vmul.f32 %v4489_v29, %v4489_v29  ;;  %v2944_v50 = vld [vmem:[#allocation19 + $0x14] ss:$8 sps:$4 sm:$0xff]  }
 0x6e9   : > { %1870 = vmatprep.subr.bf16.mxu0 %v2944_v50  ;;  %v4535_v26 = vld [vmem:[#allocation17] ss:$0 sm:$0xff] }
 0x6ea   : > { %v4492_v41 = vadd.f32 %v1627_v37, %v4220_v51  ;;  %1652 = vadd.xlane.f32.xlu1 %v4485_v30  ;;  %1871 = vmatpush1.bf16.msra.mxu0 %v2942_v45  ;;  %v2950_v51 = vld [vmem:[#allocation19 + $0x34] ss:$8 sps:$4 sm:$0xff]  }
 0x6eb   : > { %1872 = vmatprep.subr.bf16.mxu0 %v2947_v44  ;;  %v2963_v44 = vld [vmem:[#allocation22 + $0x40] sm:$0xff]  }
 0x6ec   : > { %1654 = vadd.xlane.f32.xlu0 %v4492_v41  ;;  %2623 = vmatprep.subr.bf16.mxu1 %v2963_v44 }
 0x6ee   : > { %1680 = vadd.xlane.f32.xlu1 %v1672_v40  ;;  %1873 = vmatpush1.bf16.msra.mxu0 %v2945_v4  ;;  %v2964_v4 = vld [vmem:[#allocation22] sm:$0xff]  }
 0x6ef   : > { %1874 = vmatprep.subr.bf16.mxu0 %v2950_v51  ;;  %2624 = vmatpush3.bf16.msra.mxu1 %v2964_v4  ;;  %v2966_v51 = vld [vmem:[#allocation22 + $0x8] sm:$0xff]  }
 0x6f0   : > { %1682 = vadd.xlane.f32.xlu0 %v1673_v2 }
 0x6f2   : > { %1875 = vmatpush1.bf16.msra.mxu0 %v2948_v31 }
 0x6f3   : > { %1876 = vmatprep.subr.bf16.mxu0 %v2953_v38 }
 0x6f6   : > { %1877 = vmatpush1.bf16.msra.mxu0 %v2951_v46 }
 0x6f7   : > { %1878 = vmatprep.subr.bf16.mxu0 %v2956_v48 }
 0x6fa   : > { %1879 = vmatpush1.bf16.msra.mxu0 %v2954_v33 }
 0x6fb   : > { %1880 = vmatprep.subr.bf16.mxu0 %v2959_v49 }
 0x6fe   : > { %1881 = vmatpush1.bf16.msra.mxu0 %v2957_v27 }
 0x6ff   : > { %1882 = vmatprep.subr.bf16.mxu0 %v2962_v56 }
 0x702   : > { %1883 = vmatpush1.bf16.msra.mxu0 %v2960_v14 }
 0x73e   : > { %v1645_v57 = vpop.xlane.xlu1 %1644 }
 0x73f   : > { %v1658_v60 = vmul.f32 0.0078125, %v1645_v57 }
 0x741   : > { %v4501_v52 = vsub.f32 %v4462_v36, %v1658_v60 }
 0x742   : > { %v1647_v24 = vpop.xlane.xlu1 %1646 }
 0x743   : > { %v1659_v54 = vmul.f32 0.0078125, %v1647_v24  ;;  %v1674_v58 = vmul.f32 %v4501_v52, %v4501_v52 }
 0x745   : > { %v4506_v55 = vsub.f32 %v4467_v13, %v1659_v54  ;;  %1684 = vadd.xlane.f32.xlu1 %v1674_v58 }
 0x747   : > { %v1675_v3 = vmul.f32 %v4506_v55, %v4506_v55 }
 0x749   : > { %1686 = vadd.xlane.f32.xlu0 %v1675_v3 }
 0x74e   : > { %v1649_v47 = vpop.xlane.xlu1 %1648 }
 0x74f   : > { %v1660_v43 = vmul.f32 0.0078125, %v1649_v47 }
 0x750   : > { %v1651_v11 = vpop.xlane.xlu0 %1650 }
 0x751   : > { %v4511_v18 = vsub.f32 %v4472_v5, %v1660_v43  ;;  %v1661_v10 = vmul.f32 0.0078125, %v1651_v11 }
 0x753   : > { %v4514_v62 = vsub.f32 %v4476_v34, %v1661_v10  ;;  %v1676_v6 = vmul.f32 %v4511_v18, %v4511_v18 }
 0x755   : > { %1688 = vadd.xlane.f32.xlu1 %v1676_v6  ;;  %v1677_v21 = vmul.f32 %v4514_v62, %v4514_v62  ;;  %v2967_v6 = vld [vmem:[#allocation22 + $0x50] sm:$0xff]  }
 0x757   : > { %1690 = vadd.xlane.f32.xlu0 %v1677_v21 }
 0x777   : > { %v1653_v12 = vpop.xlane.xlu1 %1652 }
 0x778   : > { %v1662_v16 = vmul.f32 0.0078125, %v1653_v12  ;;  %v2969_v12 = vld [vmem:[#allocation22 + $0x58] sm:$0xff]  }
 0x779   : > { %v1655_v35 = vpop.xlane.xlu0 %1654 }
 0x77a   : > { %v4521_v7 = vsub.f32 %v4485_v30, %v1662_v16  ;;  %v1663_v19 = vmul.f32 0.0078125, %v1655_v35 }
 0x77b   : > { %v1681_v22 = vpop.xlane.xlu1 %1680 }
 0x77c   : > { %v4524_v42 = vsub.f32 %v4492_v41, %v1663_v19  ;;  %v1696_v32 = vmul.f32 0.0078125, %v1681_v22  ;;  %v1678_v53 = vmul.f32 %v4521_v7, %v4521_v7  ;;  %v2971_v19 = vld [vmem:[#allocation22 + $0x60] sm:$0xff]  }
 0x77d   : > { %v1683_v61 = vpop.xlane.xlu0 %1682 }
 0x77e   : > { %v1704_v15 = vadd.f32 1e-05, %v1696_v32  ;;  %v1697_v20 = vmul.f32 0.0078125, %v1683_v61  ;;  %1692 = vadd.xlane.f32.xlu1 %v1678_v53  ;;  %v1679_v25 = vmul.f32 %v4524_v42, %v4524_v42  ;;  %v2972_v32 = vld [vmem:[#allocation22 + $0x20] sm:$0xff]  }
 0x780   : > { %3059 = vrsqrt.f32 %v1704_v15  ;;  %v1705_v8 = vadd.f32 1e-05, %v1697_v20  ;;  %1694 = vadd.xlane.f32.xlu0 %v1679_v25  ;;  %v2973_v20 = vld [vmem:[#allocation22 + $0x68] sm:$0xff]  }
 0x781   : > { %v2974_v25 = vld [vmem:[#allocation22 + $0x28] sm:$0xff]  }
 0x782   : > { %3061 = vrsqrt.f32 %v1705_v8 }
 0x78a   : > { %v3060_v23 = vpop.eup %3059 }
 0x78b   : > { %v1720_v1 = vmul.f32 %v3060_v23, %v4482_v39  ;;  %v2965_v39 = vld [vmem:[#allocation22 + $0x48] sm:$0xff]  }
 0x78c   : > { %v3062_v28 = vpop.eup %3061  ;;  %2625 = vmatprep.subr.bf16.mxu1 %v2965_v39 }
 0x78d   : > { %v1734_v59 = vmul.f32 %v4530_v63, %v1720_v1  ;;  %v1721_v37 = vmul.f32 %v3062_v28, %v4489_v29  ;;  %2626 = vmatpush3.bf16.msra.mxu1 %v2966_v51  ;;  %v2975_v1 = vld [vmem:[#allocation22 + $0x70] sm:$0xff]  }
 0x78e   : > { %2627 = vmatprep.subr.bf16.mxu1 %v2967_v6  ;;  %v2976_v28 = vld [vmem:[#allocation22 + $0x30] sm:$0xff]  }
 0x78f   : > { %v1735_v40 = vmul.f32 %v4530_v63, %v1721_v37  ;;  %v1748_v2 = vadd.f32 %v4535_v26, %v1734_v59  ;;  %v2978_v59 = vld [vmem:[#allocation22 + $0x38] sm:$0xff]  }
 0x791   : > { %v1749_v50 = vadd.f32 %v4535_v26, %v1735_v40 }
 0x793   : > { %v1756_v45 = vpack.c.bf16 %v1749_v50, %v1748_v2 }
 0x795   : > { %1901 = vmatmul.mubr.bf16.vlgmr.msra.gmra.mrb[28].mxu0 %v1756_v45 }
 0x796   : > { %1910 = vmatprep.mubr.bf16.mxu0 %v3621_v0 }
 0x7d2   : > { %v1685_v29 = vpop.xlane.xlu1 %1684 }
 0x7d3   : > { %v1698_v31 = vmul.f32 0.0078125, %v1685_v29 }
 0x7d5   : > { %v1706_v38 = vadd.f32 1e-05, %v1698_v31 }
 0x7d6   : > { %v1687_v46 = vpop.xlane.xlu0 %1686 }
 0x7d7   : > { %3063 = vrsqrt.f32 %v1706_v38  ;;  %v1699_v48 = vmul.f32 0.0078125, %v1687_v46 }
 0x7d9   : > { %v1707_v33 = vadd.f32 1e-05, %v1699_v48 }
 0x7db   : > { %3065 = vrsqrt.f32 %v1707_v33  ;;  %v1778_v33 = vlaneseq }
 0x7e1   : > { %v3064_v49 = vpop.eup %3063 }
 0x7e2   : > { %v1689_v27 = vpop.xlane.xlu1 %1688  ;;  %v1722_v56 = vmul.f32 %v3064_v49, %v4501_v52  ;;  %v2968_v52 = vld [vmem:[#allocation22 + $0x10] sm:$0xff]   ;;  %v1779_v49 = vshrl.u32 %v1778_v33, 7 }
 0x7e3   : > { %v1700_v14 = vmul.f32 0.0078125, %v1689_v27  ;;  %2628 = vmatpush3.bf16.msra.mxu1 %v2968_v52 }
 0x7e4   : > { %v1691_v57 = vpop.xlane.xlu0 %1690  ;;  %v1736_v3 = vmul.f32 %v4530_v63, %v1722_v56  ;;  %2629 = vmatprep.subr.bf16.mxu1 %v2969_v12  ;;  %v1780_v27 = vsub.s32 0, %v1779_v49  ;;  %v1776_v56 = vld [vmem:[#allocation20] sm:$0x3] }
 0x7e5   : > { %v3066_v60 = vpop.eup %3065  ;;  %v1708_v24 = vadd.f32 1e-05, %v1700_v14  ;;  %v1701_v54 = vmul.f32 0.0078125, %v1691_v57  ;;  %v1784_v14 = vsub.s32 1, %v1779_v49 }
 0x7e6   : > { %v1723_v58 = vmul.f32 %v3066_v60, %v4506_v55  ;;  %v1750_v11 = vadd.f32 %v4535_v26, %v1736_v3  ;;  %v2970_v55 = vld [vmem:[#allocation22 + $0x18] sm:$0xff]   ;;  %v4561_v57 = vrot.slane %v1776_v56, %v1780_v27 }
 0x7e7   : > { %3067 = vrsqrt.f32 %v1708_v24  ;;  %v1709_v47 = vadd.f32 1e-05, %v1701_v54  ;;  %2630 = vmatpush3.bf16.msra.mxu1 %v2970_v55 }
 0x7e8   : > { %v1737_v43 = vmul.f32 %v4530_v63, %v1723_v58  ;;  %2631 = vmatprep.subr.bf16.mxu1 %v2971_v19 }
 0x7e9   : > { %3069 = vrsqrt.f32 %v1709_v47 }
 0x7ea   : > { %v1751_v10 = vadd.f32 %v4535_v26, %v1737_v43 }
 0x7eb   : > { %2632 = vmatpush3.bf16.msra.mxu1 %v2972_v32 }
 0x7ec   : > { %v1757_v21 = vpack.c.bf16 %v1751_v10, %v1750_v11  ;;  %2633 = vmatprep.subr.bf16.mxu1 %v2973_v20 }
 0x7ee   : > { %1911 = vmatmul.mubr.bf16.gmra.mrb[32].mxu0 %v1757_v21 }
 0x7ef   : > { %1920 = vmatprep.mubr.bf16.mxu0 %v3621_v0  ;;  %2634 = vmatpush3.bf16.msra.mxu1 %v2974_v25 }
 0x7f0   : > { %2635 = vmatprep.subr.bf16.mxu1 %v2975_v1 }
 0x7f1   : > { %v3068_v16 = vpop.eup %3067 }
 0x7f2   : > { %v1724_v35 = vmul.f32 %v3068_v16, %v4511_v18 }
 0x7f3   : > { %v3070_v22 = vpop.eup %3069  ;;  %2636 = vmatpush3.bf16.msra.mxu1 %v2976_v28 }
 0x7f4   : > { %v1725_v53 = vmul.f32 %v3070_v22, %v4514_v62  ;;  %v1738_v61 = vmul.f32 %v4530_v63, %v1724_v35  ;;  %v2977_v62 = vld [vmem:[#allocation22 + $0x78] sm:$0xff]  }
 0x7f5   : > { %2637 = vmatprep.subr.bf16.mxu1 %v2977_v62 }
 0x7f6   : > { %v1739_v15 = vmul.f32 %v4530_v63, %v1725_v53  ;;  %v1752_v8 = vadd.f32 %v4535_v26, %v1738_v61 }
 0x7f7   : > { %2638 = vmatpush3.bf16.msra.mxu1 %v2978_v59 }
 0x7f8   : > { %v1753_v23 = vadd.f32 %v4535_v26, %v1739_v15 }
 0x7fa   : > { %v1758_v18 = vpack.c.bf16 %v1753_v23, %v1752_v8 }
 0x7fc   : > { %1921 = vmatmul.mubr.bf16.gmra.mrb[36].mxu0 %v1758_v18 }
 0x7fd   : > { %1930 = vmatprep.mubr.bf16.mxu0 %v3621_v0 }
 0x80b   : > { %v1693_v37 = vpop.xlane.xlu1 %1692 }
 0x80c   : > { %v1702_v40 = vmul.f32 0.0078125, %v1693_v37 }
 0x80d   : > { %v1695_v2 = vpop.xlane.xlu0 %1694 }
 0x80e   : > { %v1710_v50 = vadd.f32 1e-05, %v1702_v40  ;;  %v1703_v45 = vmul.f32 0.0078125, %v1695_v2 }
 0x810   : > { %3071 = vrsqrt.f32 %v1710_v50  ;;  %v1711_v44 = vadd.f32 1e-05, %v1703_v45 }
 0x812   : > { %3073 = vrsqrt.f32 %v1711_v44 }
 0x81a   : > { %v3072_v4 = vpop.eup %3071 }
 0x81b   : > { %v1726_v39 = vmul.f32 %v3072_v4, %v4521_v7  ;;  %v4563_v7 = vrot.slane %v1776_v56, %v1784_v14 }
 0x81c   : > { %v3074_v51 = vpop.eup %3073 }
 0x81d   : > { %v1727_v29 = vmul.f32 %v3074_v51, %v4524_v42  ;;  %v1740_v0 = vmul.f32 %v4530_v63, %v1726_v39 }
 0x81f   : > { %v1741_v31 = vmul.f32 %v4530_v63, %v1727_v29  ;;  %v1754_v38 = vadd.f32 %v4535_v26, %v1740_v0 }
 0x821   : > { %v1755_v46 = vadd.f32 %v4535_v26, %v1741_v31 }
 0x823   : > { %v1759_v48 = vpack.c.bf16 %v1755_v46, %v1754_v38 }
 0x825   : > { %1931 = vmatmul.mubr.bf16.gmra.mrb[40].mxu0 %v1759_v48 }
 0x868   : > { %v1902_v42 = vpop.f32.mrb[28].mxu0 }
 0x869   : > { %v1903_v60 = vadd.f32 %v1902_v42, %v4561_v57  ;;  %v1904_v24 = vpop.f32.mrb[29].mxu0 }
 0x86a   : > { %v1905_v63 = vadd.f32 %v1904_v24, %v4563_v7  ;;  %v1906_v54 = vpop.f32.mrb[30].mxu0 }
 0x86b   : > { %v1957_v58 = vmul.f32 0.70710677, %v1903_v60  ;;  %v1907_v26 = vadd.f32 %v1906_v54, %v4561_v57  ;;  %v1908_v3 = vpop.f32.mrb[31].mxu0  ;;  %v1941_v35 = vmul.f32 0.5, %v1903_v60 }
 0x86c   : > { %v1958_v47 = vmul.f32 0.70710677, %v1905_v63  ;;  %v1909_v43 = vadd.f32 %v1908_v3, %v4563_v7  ;;  %v1942_v32 = vmul.f32 0.5, %v1905_v63 }
 0x86d   : > { %3075 = verf.f32 %v1957_v58  ;;  %v1959_v11 = vmul.f32 0.70710677, %v1907_v26  ;;  %v1943_v19 = vmul.f32 0.5, %v1907_v26 }
 0x86e   : > { %3077 = verf.f32 %v1958_v47  ;;  %v1960_v10 = vmul.f32 0.70710677, %v1909_v43  ;;  %v1944_v53 = vmul.f32 0.5, %v1909_v43 }
 0x86f   : > { %3079 = verf.f32 %v1959_v11 }
 0x870   : > { %3081 = verf.f32 %v1960_v10 }
 0x877   : > { %v3076_v6 = vpop.eup %3075 }
 0x878   : > { %v3078_v52 = vpop.eup %3077  ;;  %v1989_v21 = vadd.f32 1.0, %v3076_v6 }
 0x879   : > { %v3080_v12 = vpop.eup %3079  ;;  %v1990_v55 = vadd.f32 1.0, %v3078_v52 }
 0x87a   : > { %v3082_v16 = vpop.eup %3081  ;;  %v1991_v22 = vadd.f32 1.0, %v3080_v12  ;;  %v2005_v15 = vmul.f32 %v1989_v21, %v1941_v35 }
 0x87b   : > { %v1992_v61 = vadd.f32 1.0, %v3082_v16  ;;  %v2006_v25 = vmul.f32 %v1990_v55, %v1942_v32 }
 0x87c   : > { %v2007_v20 = vmul.f32 %v1991_v22, %v1943_v19 }
 0x87d   : > { %v2008_v8 = vmul.f32 %v1992_v61, %v1944_v53 }
 0x87e   : > { %v2021_v23 = vpack.c.bf16 %v2007_v20, %v2005_v15 }
 0x87f   : > { %v2022_v18 = vpack.c.bf16 %v2008_v8, %v2006_v25 }
 0x881   : > { %2196 = vmatprep.mubr.bf16.mxu1 %v2022_v18 }
 0x882   : > { %2197 = vmatmul.mubr.bf16.vlgmr.msra.gmra.mrb[20].mxu1 %v2021_v23 }
 0x8c1   : > { %v1912_v1 = vpop.f32.mrb[32].mxu0 }
 0x8c2   : > { %v1913_v28 = vadd.f32 %v1912_v1, %v4561_v57  ;;  %v1914_v62 = vpop.f32.mrb[33].mxu0 }
 0x8c3   : > { %v1915_v59 = vadd.f32 %v1914_v62, %v4563_v7  ;;  %v1916_v37 = vpop.f32.mrb[34].mxu0 }
 0x8c4   : > { %v1961_v40 = vmul.f32 0.70710677, %v1913_v28  ;;  %v1917_v2 = vadd.f32 %v1916_v37, %v4561_v57  ;;  %v1918_v50 = vpop.f32.mrb[35].mxu0  ;;  %v1945_v27 = vmul.f32 0.5, %v1913_v28 }
 0x8c5   : > { %v1962_v45 = vmul.f32 0.70710677, %v1915_v59  ;;  %v1919_v44 = vadd.f32 %v1918_v50, %v4563_v7  ;;  %v1946_v63 = vmul.f32 0.5, %v1915_v59 }
 0x8c6   : > { %3083 = verf.f32 %v1961_v40  ;;  %v1963_v4 = vmul.f32 0.70710677, %v1917_v2  ;;  %v1947_v54 = vmul.f32 0.5, %v1917_v2 }
 0x8c7   : > { %3085 = verf.f32 %v1962_v45  ;;  %v1964_v39 = vmul.f32 0.70710677, %v1919_v44  ;;  %v1948_v47 = vmul.f32 0.5, %v1919_v44 }
 0x8c8   : > { %3087 = verf.f32 %v1963_v4 }
 0x8c9   : > { %3089 = verf.f32 %v1964_v39 }
 0x8cf   : > { %v1922_v51 = vpop.f32.mrb[36].mxu0 }
 0x8d0   : > { %v3084_v29 = vpop.eup %3083  ;;  %v1923_v0 = vadd.f32 %v1922_v51, %v4561_v57  ;;  %v1924_v31 = vpop.f32.mrb[37].mxu0 }
 0x8d1   : > { %v3086_v38 = vpop.eup %3085  ;;  %v1993_v46 = vadd.f32 1.0, %v3084_v29  ;;  %v1925_v48 = vadd.f32 %v1924_v31, %v4563_v7  ;;  %v1926_v33 = vpop.f32.mrb[38].mxu0 }
 0x8d2   : > { %v3088_v49 = vpop.eup %3087  ;;  %v1994_v56 = vadd.f32 1.0, %v3086_v38  ;;  %v1965_v14 = vmul.f32 0.70710677, %v1923_v0  ;;  %v1927_v42 = vadd.f32 %v1926_v33, %v4561_v57  ;;  %v1928_v60 = vpop.f32.mrb[39].mxu0  ;;  %v1949_v53 = vmul.f32 0.5, %v1923_v0 }
 0x8d3   : > { %v3090_v24 = vpop.eup %3089  ;;  %v1995_v58 = vadd.f32 1.0, %v3088_v49  ;;  %v1966_v26 = vmul.f32 0.70710677, %v1925_v48  ;;  %v2009_v3 = vmul.f32 %v1993_v46, %v1945_v27  ;;  %v1929_v6 = vadd.f32 %v1928_v60, %v4563_v7 }
 0x8d4   : > { %v1996_v43 = vadd.f32 1.0, %v3090_v24  ;;  %3091 = verf.f32 %v1965_v14  ;;  %v1967_v10 = vmul.f32 0.70710677, %v1927_v42  ;;  %v2010_v52 = vmul.f32 %v1994_v56, %v1946_v63 }
 0x8d5   : > { %v2011_v11 = vmul.f32 %v1995_v58, %v1947_v54  ;;  %3093 = verf.f32 %v1966_v26  ;;  %v1968_v12 = vmul.f32 0.70710677, %v1929_v6  ;;  %v1951_v15 = vmul.f32 0.5, %v1927_v42 }
 0x8d6   : > { %v2012_v21 = vmul.f32 %v1996_v43, %v1948_v47  ;;  %3095 = verf.f32 %v1967_v10  ;;  %v1950_v8 = vmul.f32 0.5, %v1925_v48  ;;  %v1952_v1 = vmul.f32 0.5, %v1929_v6  ;;  %v2554_v10 = vld [vmem:[#allocation23] ss:$0 sm:$0xff] }
 0x8d7   : > { %v2023_v55 = vpack.c.bf16 %v2011_v11, %v2009_v3  ;;  %3097 = verf.f32 %v1968_v12 }
 0x8d8   : > { %v2024_v16 = vpack.c.bf16 %v2012_v21, %v2010_v52 }
 0x8da   : > { %2204 = vmatprep.mubr.bf16.mxu1 %v2024_v16 }
 0x8db   : > { %2205 = vmatmul.mubr.bf16.gmra.mrb[24].mxu1 %v2023_v55 }
 0x8de   : > { %v3092_v35 = vpop.eup %3091 }
 0x8df   : > { %v3094_v19 = vpop.eup %3093  ;;  %v1997_v22 = vadd.f32 1.0, %v3092_v35 }
 0x8e0   : > { %v3096_v32 = vpop.eup %3095  ;;  %v1998_v61 = vadd.f32 1.0, %v3094_v19 }
 0x8e1   : > { %v1999_v20 = vadd.f32 1.0, %v3096_v32  ;;  %v3098_v25 = vpop.eup %3097  ;;  %v2013_v23 = vmul.f32 %v1997_v22, %v1949_v53 }
 0x8e2   : > { %v2000_v28 = vadd.f32 1.0, %v3098_v25  ;;  %v2014_v62 = vmul.f32 %v1998_v61, %v1950_v8 }
 0x8e3   : > { %v2015_v18 = vmul.f32 %v1999_v20, %v1951_v15 }
 0x8e4   : > { %v2016_v59 = vmul.f32 %v2000_v28, %v1952_v1 }
 0x8e5   : > { %v2025_v37 = vpack.c.bf16 %v2015_v18, %v2013_v23 }
 0x8e6   : > { %v2026_v40 = vpack.c.bf16 %v2016_v59, %v2014_v62 }
 0x8e8   : > { %2212 = vmatprep.mubr.bf16.mxu1 %v2026_v40 }
 0x8e9   : > { %2213 = vmatmul.mubr.bf16.gmra.mrb[28].mxu1 %v2025_v37 }
 0x8f8   : > { %v1932_v2 = vpop.f32.mrb[40].mxu0 }
 0x8f9   : > { %v1933_v50 = vadd.f32 %v1932_v2, %v4561_v57  ;;  %v1934_v45 = vpop.f32.mrb[41].mxu0 }
 0x8fa   : > { %v1935_v44 = vadd.f32 %v1934_v45, %v4563_v7  ;;  %v1936_v4 = vpop.f32.mrb[42].mxu0 }
 0x8fb   : > { %v1969_v39 = vmul.f32 0.70710677, %v1933_v50  ;;  %v1937_v51 = vadd.f32 %v1936_v4, %v4561_v57  ;;  %v1938_v29 = vpop.f32.mrb[43].mxu0  ;;  %v1953_v42 = vmul.f32 0.5, %v1933_v50 }
 0x8fc   : > { %v1970_v0 = vmul.f32 0.70710677, %v1935_v44  ;;  %v1939_v31 = vadd.f32 %v1938_v29, %v4563_v7  ;;  %v1954_v57 = vmul.f32 0.5, %v1935_v44 }
 0x8fd   : > { %3099 = verf.f32 %v1969_v39  ;;  %v1971_v38 = vmul.f32 0.70710677, %v1937_v51  ;;  %v1955_v60 = vmul.f32 0.5, %v1937_v51 }
 0x8fe   : > { %3101 = verf.f32 %v1970_v0  ;;  %v1972_v46 = vmul.f32 0.70710677, %v1939_v31  ;;  %v1956_v63 = vmul.f32 0.5, %v1939_v31 }
 0x8ff   : > { %3103 = verf.f32 %v1971_v38 }
 0x900   : > { %3105 = verf.f32 %v1972_v46 }
 0x907   : > { %v3100_v48 = vpop.eup %3099 }
 0x908   : > { %v3102_v33 = vpop.eup %3101  ;;  %v2001_v49 = vadd.f32 1.0, %v3100_v48 }
 0x909   : > { %v3104_v27 = vpop.eup %3103  ;;  %v2002_v56 = vadd.f32 1.0, %v3102_v33 }
 0x90a   : > { %v3106_v14 = vpop.eup %3105  ;;  %v2003_v24 = vadd.f32 1.0, %v3104_v27  ;;  %v2017_v58 = vmul.f32 %v2001_v49, %v1953_v42 }
 0x90b   : > { %v2004_v54 = vadd.f32 1.0, %v3106_v14  ;;  %v2018_v26 = vmul.f32 %v2002_v56, %v1954_v57 }
 0x90c   : > { %v2019_v7 = vmul.f32 %v2003_v24, %v1955_v60 }
 0x90d   : > { %v2020_v3 = vmul.f32 %v2004_v54, %v1956_v63 }
 0x90e   : > { %v2027_v47 = vpack.c.bf16 %v2019_v7, %v2017_v58 }
 0x90f   : > { %v2028_v43 = vpack.c.bf16 %v2020_v3, %v2018_v26 }
 0x911   : > { %2220 = vmatprep.mubr.bf16.mxu1 %v2028_v43 }
 0x912   : > { %2221 = vmatmul.mubr.bf16.gmra.mrb[32].mxu1 %v2027_v47 }
 0x955   : > { %v2639_v11 = vpop.f32.mrb[20].mxu1 }
 0x956   : > { %v2640_v6 = vpop.f32.mrb[21].mxu1 }
 0x957   : > { %v2641_v52 = vadd.f32 %v2640_v6, %v2639_v11  ;;  %v2642_v21 = vpop.f32.mrb[22].mxu1 }
 0x958   : > { %v2643_v12 = vpop.f32.mrb[23].mxu1 }
 0x959   : > { %v2199_v55 = vadd.f32 %v2641_v52, %v2554_v10  ;;  %v2644_v16 = vadd.f32 %v2643_v12, %v2642_v21 }
 0x95b   : > { %v2229_v35 = vadd.f32 %v2199_v55, %v4371_v9  ;;  %v2202_v19 = vadd.f32 %v2644_v16, %v2554_v10 }
 0x95d   : > { %2237 = vst [vmem:[%s4583_s24] sm:$0xff] %v2229_v35  ;;  %v2230_v22 = vadd.f32 %v2202_v19, %v4378_v17 }
 0x95f   : > { %2238 = vst [vmem:[%s4583_s24 + $0x8] sm:$0xff] %v2230_v22 }
 0x9ae   : > { %v2645_v32 = vpop.f32.mrb[24].mxu1 }
 0x9af   : > { %v2646_v53 = vpop.f32.mrb[25].mxu1 }
 0x9b0   : > { %v2647_v61 = vadd.f32 %v2646_v53, %v2645_v32  ;;  %v2648_v15 = vpop.f32.mrb[26].mxu1 }
 0x9b1   : > { %v2649_v20 = vpop.f32.mrb[27].mxu1 }
 0x9b2   : > { %v2207_v25 = vadd.f32 %v2647_v61, %v2554_v10  ;;  %v2650_v8 = vadd.f32 %v2649_v20, %v2648_v15 }
 0x9b4   : > { %v2231_v9 = vadd.f32 %v2207_v25, %v4462_v36  ;;  %v2210_v23 = vadd.f32 %v2650_v8, %v2554_v10 }
 0x9b6   : > { %2239 = vst [vmem:[%s4583_s24 + $0x10] sm:$0xff] %v2231_v9  ;;  %v2232_v18 = vadd.f32 %v2210_v23, %v4467_v13 }
 0x9b8   : > { %2240 = vst [vmem:[%s4583_s24 + $0x18] sm:$0xff] %v2232_v18 }
 0x9bc   : > { %v2651_v1 = vpop.f32.mrb[28].mxu1 }
 0x9bd   : > { %v2652_v28 = vpop.f32.mrb[29].mxu1 }
 0x9be   : > { %v2653_v17 = vadd.f32 %v2652_v28, %v2651_v1  ;;  %v2654_v62 = vpop.f32.mrb[30].mxu1 }
 0x9bf   : > { %v2655_v59 = vpop.f32.mrb[31].mxu1 }
 0x9c0   : > { %v2215_v37 = vadd.f32 %v2653_v17, %v2554_v10  ;;  %v2656_v40 = vadd.f32 %v2655_v59, %v2654_v62 }
 0x9c2   : > { %v2233_v2 = vadd.f32 %v2215_v37, %v4472_v5  ;;  %v2218_v50 = vadd.f32 %v2656_v40, %v2554_v10 }
 0x9c4   : > { %2241 = vst [vmem:[%s4583_s24 + $0x20] sm:$0xff] %v2233_v2  ;;  %v2234_v36 = vadd.f32 %v2218_v50, %v4476_v34 }
 0x9c6   : > { %2242 = vst [vmem:[%s4583_s24 + $0x28] sm:$0xff] %v2234_v36 }
 0x9e5   : > { %v2657_v13 = vpop.f32.mrb[32].mxu1 }
 0x9e6   : > { %v2658_v45 = vpop.f32.mrb[33].mxu1 }
 0x9e7   : > { %v2659_v44 = vadd.f32 %v2658_v45, %v2657_v13  ;;  %v2660_v4 = vpop.f32.mrb[34].mxu1 }
 0x9e8   : > { %v2661_v39 = vpop.f32.mrb[35].mxu1 }
 0x9e9   : > { %v2223_v51 = vadd.f32 %v2659_v44, %v2554_v10  ;;  %v2662_v29 = vadd.f32 %v2661_v39, %v2660_v4 }
 0x9eb   : > { %v2235_v5 = vadd.f32 %v2223_v51, %v4485_v30  ;;  %v2226_v0 = vadd.f32 %v2662_v29, %v2554_v10 }
 0x9ed   : > { %2243 = vst [vmem:[%s4583_s24 + $0x30] sm:$0xff] %v2235_v5  ;;  %v2236_v34 = vadd.f32 %v2226_v0, %v4492_v41 }
 0x9ef   : > { %2244 = vst [vmem:[%s4583_s24 + $0x38] sm:$0xff] %v2236_v34 }
 0x9f0   : > { %3516 = shalt.err (!%p3513_p2)
}
 0x9f1   : > { %s3517_s17 = scalar_lea.hbm %s4602_s29, 1024  ;;  %s3521_s19 = scalar_lea.hbm %s4734_s8, 2048 }
 0x9f2   : > { %p3518_p10 = scmp.ne.s32.totalorder %s4602_s29, %s3517_s17  ;;  %p3522_p7 = scmp.lt.u32.totalorder %s4602_s29, %s4734_s8 }
 0x9f3   : > { %p3523_p9 = scmp.lt.u32.totalorder %s3521_s19, %s3517_s17  ;;  %p3525_p12 = scmp.lt.u32.totalorder %s3517_s17, %s4602_s29 }
 0x9f4   : > { %p3519_p11 = pnand %p3518_p10, %p4735_p3 }
 0x9f5   : > { %p3524_p8 = por %p3523_p9, %p3522_p7 }
 0x9f6   : > { %p3520_p5 = pneg %p3519_p11 }
 0x9f7   : > { %p3526_p4 = por %p3525_p12, %p3524_p8 }
 0x9f9   : > { %p3527_p1 = pnand %p3526_p4, %p3520_p5 }
 0x9fb   : > { %3530 = shalt.err (!%p3527_p1)
}
 0x9fc   : > { %s3625_s23 = smov 128   ;;  %s3626_s9 = smov 8  }
 0x9fd   : > { %2803 = dma.vmem_to_hbm [thread:$0]  (%p4735_p3), %s4604_s26, 1024, %s4602_s29, %s2246_s14, %s3625_s23, %s3625_s23, %s3626_s9  }
 0x9fe PF: > { %s4736_s3 = sld [smem:[#allocation36_spill]]  ;;  %p4737_p13 = scmp.ne.s32.totalorder %s4713_s20, 0 }
 0x9ff   : > { %p4738_p0 = scmp.ge.s32.totalorder %s3601_s16, 2 }
 0xa01   : > { %p2850_p6 = pnand %p4738_p0, %p4737_p13 }
 0xa04   : > { %s2275_s1 = sand.u32 1, %s4736_s3  }
 0xa05   : > { %s2276_s0 = scalar_lea.sflag [#allocation4], %s2275_s1 }
 0xa06   : > { %3584 = dma.done.wait (!%p2850_p6), %s2276_s0, 1024  }
 0xa07   : > { %3586 = vsyncadd (!%p2850_p6), %s2276_s0, 4294966272  ;;  %p36_p2 = scmp.ge.s32.totalorder %s4006_s25, 4   ;;  %s4739_s29 = smov %s3593_s30 }
 0xa08   : > { %s4740_s30 = smov %s3597_s15  ;;  %s4741_s15 = smov %s4017_s28 }
 0xa09   : > { %s4742_s16 = smov %s4006_s25  ;;  %38 = sbr.rel (!%p36_p2) target bundleno = 25 (0x19), region = 182 }
 0xa10   :  { %2281 = vsyncpa [#allocation3], 1 }
 0xa11   :  { %2283 = vsyncpa [#allocation3 + $0x1], 1 }
 0xa12   :  { %2284 = vsyncpa [#allocation6], 1 }
 0xa13   :  { %2286 = vsyncpa [#allocation6 + $0x1], 1 }
 0xa14   :  { %2287 = vsyncpa [#allocation9], 1 }
 0xa15   :  { %2288 = vsyncpa [#allocation12], 1 }
 0xa16   :  { %2289 = vsyncpa [#allocation15], 1 }
 0xa17   :  { %2290 = vsyncpa [#allocation18], 1 }
 0xa18   :  { %2291 = vsyncpa [#allocation21], 1 }
 0xa19   :  { %2292 = vsyncpa [#allocation24], 1 }
 0xa1a   :  { %2293 = vsyncpa [#allocation4], 1 }
 0xa1b   :  { %2295 = vsyncpa [#allocation4 + $0x1], 1 }

</bundles_post_ra>
